<compile_context>
chip_gen: v5e
topology: v5e:2x2
jax: 0.10.0
libtpu: 0.0.40
codegen_flags: <defaults>
</compile_context>

<pallas_src>
import functools

import jax
import jax.numpy as jnp
from jax.experimental import pallas as pl
from jax.experimental.pallas import tpu as pltpu


# ~4 MiB x-blocks: 2-in + 2-out double buffers = ~16 MiB, comfortably under
# scoped VMEM on every generation (incl. v7x's 64 MiB / 2-TC config).
TARGET_BLOCK_BYTES = 4 << 20


def _fc_path(pooled, w1_ref, b1_ref, w2_ref, b2_ref):
    """pooled (TB, C) f32 -> sigmoid scale (TB, C) f32.

    Contracts directly against the PyTorch (out, in) weight layout, so no
    per-call transpose kernels are launched.  These matmuls are tiny.
    """
    h = jax.lax.dot_general(
        pooled, w1_ref[...],
        dimension_numbers=(((1,), (1,)), ((), ())),
        preferred_element_type=jnp.float32,
        precision=jax.lax.Precision.HIGHEST)
    h = jnp.maximum(h + b1_ref[...], 0.0)                              # (TB, H)
    s = jax.lax.dot_general(
        h, w2_ref[...],
        dimension_numbers=(((1,), (1,)), ((), ())),
        preferred_element_type=jnp.float32,
        precision=jax.lax.Precision.HIGHEST)
    return jax.nn.sigmoid(s + b2_ref[...])                             # (TB, C)


def se_block_kernel_flat(x_ref, w1_ref, b1_ref, w2_ref, b2_ref,
                         pool_ref, bcast_ref, o_ref, *, inv_len):
    """Lane-dense path: x_ref / o_ref are (TB, C*L) in the native dtype.

    pool_ref (C*L, C) and bcast_ref (C, C*L) are structured 0/1 matrices in the
    native dtype; the MXU is otherwise idle so these matmuls are free-ish and
    keep the whole tile lane-dense (no masked stores, no relayouts).
    """
    # Squeeze: mean over L == (x @ ones_struct) * 1/L, f32 accumulation (exact:
    # every product is x * 1.0), no full-tile upcast.
    pooled = jax.lax.dot_general(
        x_ref[...], pool_ref[...],
        dimension_numbers=(((1,), (0,)), ((), ())),
        preferred_element_type=jnp.float32,
        precision=jax.lax.Precision.HIGHEST) * inv_len                 # (TB, C)

    s = _fc_path(pooled, w1_ref, b1_ref, w2_ref, b2_ref)               # (TB, C)

    # Excite: broadcast the per-channel scale across L via the 0/1 matmul
    # (exact), already in the native dtype (cast down at (TB, C) size).  The
    # full tile is re-read here so it is not held live across the FC chain.
    s_full = jax.lax.dot_general(
        s.astype(o_ref.dtype), bcast_ref[...],
        dimension_numbers=(((1,), (0,)), ((), ())),
        preferred_element_type=o_ref.dtype,
        precision=jax.lax.Precision.HIGHEST)                           # (TB, C*L)
    o_ref[...] = x_ref[...] * s_full


def se_block_kernel_3d(x_ref, w1_ref, b1_ref, w2_ref, b2_ref, o_ref):
    """Fallback path for L % 128 == 0 (already lane-dense) / very large C*L."""
    L = x_ref.shape[-1]
    # f32-accumulated pool without materializing an f32 copy of the tile.
    pooled = jnp.sum(x_ref[...], axis=-1, dtype=jnp.float32) * (1.0 / L)
    s = _fc_path(pooled, w1_ref, b1_ref, w2_ref, b2_ref)
    # Native-dtype excite; re-read the ref (short live range of the full tile).
    o_ref[...] = x_ref[...] * s.astype(o_ref.dtype)[:, :, None]


def _choose_batch_tile(B, row_bytes, *, target_block_bytes, sublane_tiled):
    """Largest divisor of B whose x-block fits the byte budget.

    sublane_tiled=True -> (tb, C*L) blocks where tb is the sublane dim, so tb
    must be a multiple of 8 or span the whole batch.  For the 3-D path tb is a
    leading dim with no (8,128) constraint (no multiple-of-8 preference).
    """
    cap = max(1, min(B, target_block_bytes // max(row_bytes, 1)))
    if B >= 2:
        cap = max(1, min(cap, B // 2))   # >=2 grid steps: pipelining + both v7x TCs
    divisors = [d for d in range(1, B + 1) if B % d == 0]
    if sublane_tiled:
        legal = [d for d in divisors if d % 8 == 0 or d == B]
    else:
        legal = divisors
    fitting = [d for d in legal if d <= cap]
    return fitting[-1] if fitting else legal[0]


def se_block(x, w1, b1, w2, b2, *, block_batch=None):
    """x: (B, C, L).  w1: (H, C), b1: (H,), w2: (C, H), b2: (C,) (PyTorch Linear layout)."""
    B, C, L = x.shape
    H, C_in = w1.shape
    assert C_in == C and w2.shape == (C, H) and b1.shape == (H,) and b2.shape == (C,)

    # Tiny params: f32, PyTorch layout (no transposes).
    w1f = jnp.asarray(w1, jnp.float32)                    # (H, C)
    w2f = jnp.asarray(w2, jnp.float32)                    # (C, H)
    b1r = jnp.asarray(b1, jnp.float32).reshape(1, H)
    b2r = jnp.asarray(b2, jnp.float32).reshape(1, C)

    itemsize = jnp.dtype(x.dtype).itemsize
    row_bytes = C * L * itemsize
    ones_bytes = C * L * C * itemsize
    # Lane-dense flattened path when L is not already a multiple of 128 and the
    # structured 0/1 matrices stay small enough to sit in VMEM.
    use_flat = (L % 128 != 0) and (ones_bytes <= (4 << 20))

    tb = block_batch if block_batch is not None else _choose_batch_tile(
        B, row_bytes, target_block_bytes=TARGET_BLOCK_BYTES, sublane_tiled=use_flat)
    assert B % tb == 0, "block_batch must divide the batch size"
    if use_flat:
        assert tb % 8 == 0 or tb == B, "flat path needs tb % 8 == 0 or tb == B"
    grid = (B // tb,)

    compiler_params = pltpu.CompilerParams(
        dimension_semantics=("parallel",),      # batch tiles shard across v7x TCs
        vmem_limit_bytes=48 * 1024 * 1024,      # < 64 MiB v7x physical; roomy on v5e/v6e
    )

    if use_flat:
        # Structured 0/1 matrices (values exactly 1.0 in any dtype).
        bcast_mat = jnp.repeat(jnp.eye(C, dtype=x.dtype), L, axis=1)    # (C, C*L)
        pool_mat = bcast_mat.T                                          # (C*L, C)
        x2 = x.reshape(B, C * L)                                        # free view

        grid_spec = pltpu.PrefetchScalarGridSpec(
            num_scalar_prefetch=0,
            grid=grid,
            in_specs=[
                pl.BlockSpec((tb, C * L), lambda i: (i, 0)),   # x: lane-dense batch tile
                pl.BlockSpec((H, C), lambda i: (0, 0)),        # weights: VMEM-resident
                pl.BlockSpec((1, H), lambda i: (0, 0)),
                pl.BlockSpec((C, H), lambda i: (0, 0)),
                pl.BlockSpec((1, C), lambda i: (0, 0)),
                pl.BlockSpec((C * L, C), lambda i: (0, 0)),    # pool ones
                pl.BlockSpec((C, C * L), lambda i: (0, 0)),    # broadcast ones
            ],
            out_specs=pl.BlockSpec((tb, C * L), lambda i: (i, 0)),
        )
        out2 = pl.pallas_call(
            functools.partial(se_block_kernel_flat, inv_len=1.0 / L),
            out_shape=jax.ShapeDtypeStruct((B, C * L), x.dtype),
            grid_spec=grid_spec,
            compiler_params=compiler_params,
        )(x2, w1f, b1r, w2f, b2r, pool_mat, bcast_mat)
        return out2.reshape(B, C, L)

    # Fallback: native 3-D blocks (already lane-dense when L % 128 == 0).
    grid_spec = pltpu.PrefetchScalarGridSpec(
        num_scalar_prefetch=0,
        grid=grid,
        in_specs=[
            pl.BlockSpec((tb, C, L), lambda i: (i, 0, 0)),
            pl.BlockSpec((H, C), lambda i: (0, 0)),
            pl.BlockSpec((1, H), lambda i: (0, 0)),
            pl.BlockSpec((C, H), lambda i: (0, 0)),
            pl.BlockSpec((1, C), lambda i: (0, 0)),
        ],
        out_specs=pl.BlockSpec((tb, C, L), lambda i: (i, 0, 0)),
    )
    return pl.pallas_call(
        se_block_kernel_3d,
        out_shape=jax.ShapeDtypeStruct((B, C, L), x.dtype),
        grid_spec=grid_spec,
        compiler_params=compiler_params,
    )(x, w1f, b1r, w2f, b2r)


def se_block_ref(x, w1, b1, w2, b2):
    pooled = jnp.mean(x, axis=-1)
    h = jnp.maximum(pooled @ w1.T + b1, 0.0)
    s = jax.nn.sigmoid(h @ w2.T + b2)
    return x * s[:, :, None]


if __name__ == "__main__":
    # Use full-f32 matmul precision everywhere so the jnp reference and the
    # kernel (which requests Precision.HIGHEST explicitly) agree tightly.
    jax.config.update("jax_default_matmul_precision", "highest")

    # Small shapes consistent with SEBlock(channel=32, reduction=16) on (B, C, L) input.
    B, C, L, red = 2, 32, 16, 16
    H = C // red

    key = jax.random.PRNGKey(0)
    kx, k1, k2, k3, k4 = jax.random.split(key, 5)

    x = jax.random.normal(kx, (B, C, L), dtype=jnp.float32)
    # Deterministic synthetic params in PyTorch nn.Linear layout: weight (out, in), bias (out,)
    w1 = jax.random.normal(k1, (H, C), dtype=jnp.float32) * 0.1
    b1 = jax.random.normal(k2, (H,), dtype=jnp.float32) * 0.1
    w2 = jax.random.normal(k3, (C, H), dtype=jnp.float32) * 0.1
    b2 = jax.random.normal(k4, (C,), dtype=jnp.float32) * 0.1

    out = jax.block_until_ready(se_block(x, w1, b1, w2, b2))
    ref = se_block_ref(x, w1, b1, w2, b2)

    assert out.shape == (B, C, L)
    assert out.dtype == x.dtype
    assert jnp.allclose(out, ref, atol=1e-5, rtol=1e-4), "mismatch vs reference"

    print("KERNEL_OK")
</pallas_src>

<mosaic_0001>
module attributes {stable_mosaic.version = 11 : i64} {
  func.func @se_block_kernel_flat(%arg0: i32, %arg1: memref<2x512xf32, #tpu.memory_space<vmem>>, %arg2: memref<2x32xf32, #tpu.memory_space<vmem>>, %arg3: memref<1x2xf32, #tpu.memory_space<vmem>>, %arg4: memref<32x2xf32, #tpu.memory_space<vmem>>, %arg5: memref<1x32xf32, #tpu.memory_space<vmem>>, %arg6: memref<512x32xf32, #tpu.memory_space<vmem>>, %arg7: memref<32x512xf32, #tpu.memory_space<vmem>>, %arg8: memref<2x512xf32, #tpu.memory_space<vmem>>) attributes {dimension_semantics = [#tpu.dimension_semantics<parallel>], iteration_bounds = array<i64: 1>, scalar_prefetch = 0 : i64, scratch_operands = 0 : i64, tpu.core_type = #tpu.core_type<tc>, window_params = [{transform_indices = @transform_0, window_bounds = array<i64: 2, 512>}, {pipeline_mode = #tpu.pipeline_mode<synchronous>, transform_indices = @transform_1, window_bounds = array<i64: 2, 32>}, {pipeline_mode = #tpu.pipeline_mode<synchronous>, transform_indices = @transform_2, window_bounds = array<i64: 1, 2>}, {pipeline_mode = #tpu.pipeline_mode<synchronous>, transform_indices = @transform_3, window_bounds = array<i64: 32, 2>}, {pipeline_mode = #tpu.pipeline_mode<synchronous>, transform_indices = @transform_4, window_bounds = array<i64: 1, 32>}, {pipeline_mode = #tpu.pipeline_mode<synchronous>, transform_indices = @transform_5, window_bounds = array<i64: 512, 32>}, {pipeline_mode = #tpu.pipeline_mode<synchronous>, transform_indices = @transform_6, window_bounds = array<i64: 32, 512>}, {transform_indices = @transform_7, window_bounds = array<i64: 2, 512>}]} {
    %c0 = arith.constant 0 : index
    %c0_0 = arith.constant 0 : index
    %0 = vector.load %arg1[%c0, %c0_0] : memref<2x512xf32, #tpu.memory_space<vmem>>, vector<2x512xf32>
    %c0_1 = arith.constant 0 : index
    %c0_2 = arith.constant 0 : index
    %1 = vector.load %arg6[%c0_1, %c0_2] : memref<512x32xf32, #tpu.memory_space<vmem>>, vector<512x32xf32>
    %cst = arith.constant dense<0.000000e+00> : vector<2x32xf32>
    %2 = tpu.matmul %0, %1, %cst {dimension_numbers = #tpu.dot_dimension_numbers<[1], [0], [0], [1], [0, 0, 1, 1], [], []>, precision = #tpu.contract_precision<fp32>} : vector<2x512xf32>, vector<512x32xf32>, vector<2x32xf32> -> vector<2x32xf32>
    %cst_3 = arith.constant 6.250000e-02 : f32
    %3 = vector.broadcast %cst_3 : f32 to vector<2x32xf32>
    %4 = arith.mulf %2, %3 : vector<2x32xf32>
    %c0_4 = arith.constant 0 : index
    %c0_5 = arith.constant 0 : index
    %5 = vector.load %arg2[%c0_4, %c0_5] : memref<2x32xf32, #tpu.memory_space<vmem>>, vector<2x32xf32>
    %cst_6 = arith.constant dense<0.000000e+00> : vector<2x2xf32>
    %6 = tpu.matmul %4, %5, %cst_6 {dimension_numbers = #tpu.dot_dimension_numbers<[1], [1], [0], [0], [0, 0, 1, 0], [], []>, precision = #tpu.contract_precision<fp32>} : vector<2x32xf32>, vector<2x32xf32>, vector<2x2xf32> -> vector<2x2xf32>
    %c0_7 = arith.constant 0 : index
    %c0_8 = arith.constant 0 : index
    %7 = vector.load %arg3[%c0_7, %c0_8] : memref<1x2xf32, #tpu.memory_space<vmem>>, vector<1x2xf32>
    %8 = vector.broadcast %7 : vector<1x2xf32> to vector<2x2xf32>
    %9 = arith.addf %6, %8 : vector<2x2xf32>
    %cst_9 = arith.constant 0.000000e+00 : f32
    %10 = vector.broadcast %cst_9 : f32 to vector<2x2xf32>
    %11 = arith.maximumf %9, %10 : vector<2x2xf32>
    %c0_10 = arith.constant 0 : index
    %c0_11 = arith.constant 0 : index
    %12 = vector.load %arg4[%c0_10, %c0_11] : memref<32x2xf32, #tpu.memory_space<vmem>>, vector<32x2xf32>
    %cst_12 = arith.constant dense<0.000000e+00> : vector<2x32xf32>
    %13 = tpu.matmul %11, %12, %cst_12 {dimension_numbers = #tpu.dot_dimension_numbers<[1], [1], [0], [0], [0, 0, 1, 0], [], []>, precision = #tpu.contract_precision<fp32>} : vector<2x2xf32>, vector<32x2xf32>, vector<2x32xf32> -> vector<2x32xf32>
    %c0_13 = arith.constant 0 : index
    %c0_14 = arith.constant 0 : index
    %14 = vector.load %arg5[%c0_13, %c0_14] : memref<1x32xf32, #tpu.memory_space<vmem>>, vector<1x32xf32>
    %15 = vector.broadcast %14 : vector<1x32xf32> to vector<2x32xf32>
    %16 = arith.addf %13, %15 : vector<2x32xf32>
    %17 = arith.negf %16 : vector<2x32xf32>
    %18 = math.exp %17 : vector<2x32xf32>
    %cst_15 = arith.constant 1.000000e+00 : f32
    %19 = vector.broadcast %cst_15 : f32 to vector<2x32xf32>
    %20 = arith.addf %19, %18 : vector<2x32xf32>
    %21 = arith.divf %19, %20 : vector<2x32xf32>
    %c0_16 = arith.constant 0 : index
    %c0_17 = arith.constant 0 : index
    %22 = vector.load %arg7[%c0_16, %c0_17] : memref<32x512xf32, #tpu.memory_space<vmem>>, vector<32x512xf32>
    %cst_18 = arith.constant dense<0.000000e+00> : vector<2x512xf32>
    %23 = tpu.matmul %21, %22, %cst_18 {dimension_numbers = #tpu.dot_dimension_numbers<[1], [0], [0], [1], [0, 0, 1, 1], [], []>, precision = #tpu.contract_precision<fp32>} : vector<2x32xf32>, vector<32x512xf32>, vector<2x512xf32> -> vector<2x512xf32>
    %c0_19 = arith.constant 0 : index
    %c0_20 = arith.constant 0 : index
    %24 = vector.load %arg1[%c0_19, %c0_20] : memref<2x512xf32, #tpu.memory_space<vmem>>, vector<2x512xf32>
    %25 = arith.mulf %24, %23 : vector<2x512xf32>
    %c0_21 = arith.constant 0 : index
    %c0_22 = arith.constant 0 : index
    %26 = vector.load %arg8[%c0_21, %c0_22] : memref<2x512xf32, #tpu.memory_space<vmem>>, vector<2x512xf32>
    tpu.vector_store %arg8[%c0_21, %c0_22], %25 {strides = array<i32>} : memref<2x512xf32, #tpu.memory_space<vmem>>, vector<2x512xf32>,
    return
  }
  func.func @transform_0(%arg0: i32) -> (i32, i32) {
    %c0_i32 = arith.constant 0 : i32
    %c0_i32_0 = arith.constant 0 : i32
    return %arg0, %c0_i32 : i32, i32
  }
  func.func @transform_1(%arg0: i32) -> (i32, i32) {
    %c0_i32 = arith.constant 0 : i32
    %c0_i32_0 = arith.constant 0 : i32
    %c0_i32_1 = arith.constant 0 : i32
    return %c0_i32, %c0_i32_0 : i32, i32
  }
  func.func @transform_2(%arg0: i32) -> (i32, i32) {
    %c0_i32 = arith.constant 0 : i32
    %c0_i32_0 = arith.constant 0 : i32
    %c0_i32_1 = arith.constant 0 : i32
    return %c0_i32, %c0_i32_0 : i32, i32
  }
  func.func @transform_3(%arg0: i32) -> (i32, i32) {
    %c0_i32 = arith.constant 0 : i32
    %c0_i32_0 = arith.constant 0 : i32
    %c0_i32_1 = arith.constant 0 : i32
    return %c0_i32, %c0_i32_0 : i32, i32
  }
  func.func @transform_4(%arg0: i32) -> (i32, i32) {
    %c0_i32 = arith.constant 0 : i32
    %c0_i32_0 = arith.constant 0 : i32
    %c0_i32_1 = arith.constant 0 : i32
    return %c0_i32, %c0_i32_0 : i32, i32
  }
  func.func @transform_5(%arg0: i32) -> (i32, i32) {
    %c0_i32 = arith.constant 0 : i32
    %c0_i32_0 = arith.constant 0 : i32
    %c0_i32_1 = arith.constant 0 : i32
    return %c0_i32, %c0_i32_0 : i32, i32
  }
  func.func @transform_6(%arg0: i32) -> (i32, i32) {
    %c0_i32 = arith.constant 0 : i32
    %c0_i32_0 = arith.constant 0 : i32
    %c0_i32_1 = arith.constant 0 : i32
    return %c0_i32, %c0_i32_0 : i32, i32
  }
  func.func @transform_7(%arg0: i32) -> (i32, i32) {
    %c0_i32 = arith.constant 0 : i32
    %c0_i32_0 = arith.constant 0 : i32
    return %arg0, %c0_i32 : i32, i32
  }
}

</mosaic_0001>

<bundles_post_ra>
// kernel: tpu_custom_call.1
= control target key start
LH: loop header
LB: loop body
LE: loop exit
PB: predicated region body
PF: predicated region fallthrough
CT: control target
= control target key end

     0   :  { %s4192_s0 = inlined_call_operand.vmem [shape: f32[2,512], index: 0, kind: input, shape index: {}]   ;;  %s4193_s1 = inlined_call_operand.vmem [shape: f32[2,32], index: 1, kind: input, shape index: {}]   ;;  %s4194_s2 = inlined_call_operand.vmem [shape: f32[1,2], index: 2, kind: input, shape index: {}]   ;;  %s4195_s3 = inlined_call_operand.vmem [shape: f32[32,2], index: 3, kind: input, shape index: {}]   ;;  %s4196_s4 = inlined_call_operand.vmem [shape: f32[1,32], index: 4, kind: input, shape index: {}]   ;;  %s4197_s5 = inlined_call_operand.vmem [shape: f32[512,32], index: 5, kind: input, shape index: {}]   ;;  %s4198_s6 = inlined_call_operand.vmem [shape: f32[32,512], index: 6, kind: input, shape index: {}]   ;;  %s4199_s7 = inlined_call_operand.hbm [shape: f32[2,512], index: 7, kind: output, shape index: {}]  }
   0x1   :  { %v43_v0 = vld [vmem:[%s4197_s5 + $0x78] sm:$0xff]  ;;  %v42_v1 = vld [vmem:[%s4197_s5 + $0x70] sm:$0xff]  ;;  %v41_v2 = vld [vmem:[%s4197_s5 + $0x68] sm:$0xff] }
   0x2   :  { %v2729_v3 = vand.u32 4294901760, %v43_v0  ;;  %v2731_v4 = vand.u32 4294901760, %v42_v1  ;;  %v2733_v5 = vand.u32 4294901760, %v41_v2  ;;  %v40_v6 = vld [vmem:[%s4197_s5 + $0x60] sm:$0xff]  ;;  %v39_v7 = vld [vmem:[%s4197_s5 + $0x58] sm:$0xff]  ;;  %v38_v8 = vld [vmem:[%s4197_s5 + $0x50] sm:$0xff] }
   0x3   :  { %v2744_v9 = vand.u32 4294901760, %v40_v6  ;;  %v2746_v10 = vand.u32 4294901760, %v39_v7  ;;  %v2748_v11 = vand.u32 4294901760, %v38_v8  ;;  %v37_v12 = vld [vmem:[%s4197_s5 + $0x48] sm:$0xff]  ;;  %v36_v13 = vld [vmem:[%s4197_s5 + $0x40] sm:$0xff]  ;;  %v35_v18 = vld [vmem:[%s4197_s5 + $0x38] sm:$0xff] }
   0x4   :  { %103 = vmatpush.msra.mxu0 %v2729_v3  ;;  %v2758_v14 = vsub.f32 %v43_v0, %v2729_v3  ;;  %v2761_v15 = vsub.f32 %v42_v1, %v2731_v4  ;;  %299 = vmatpush.msra.mxu3 %v2729_v3  ;;  %v2765_v16 = vsub.f32 %v41_v2, %v2733_v5  ;;  %v2767_v17 = vand.u32 4294901760, %v37_v12  ;;  %v34_v26 = vld [vmem:[%s4197_s5 + $0x30] sm:$0xff]  ;;  %v33_v34 = vld [vmem:[%s4197_s5 + $0x28] sm:$0xff] }
   0x5   :  { %v2773_v19 = vsub.f32 %v40_v6, %v2744_v9  ;;  %v2776_v20 = vsub.f32 %v39_v7, %v2746_v10  ;;  %v2779_v21 = vsub.f32 %v38_v8, %v2748_v11  ;;  %v2786_v25 = vand.u32 4294901760, %v36_v13 }
   0x6   :  { %105 = vmatpush.msra.mxu0 %v2731_v4  ;;  %246 = vmatpush.msra.mxu2 %v2758_v14  ;;  %v145_v22 = vand.u32 4294901760, %v2758_v14  ;;  %v4214_v23 = vand.u32 4294901760, %v2761_v15  ;;  %v4212_v24 = vand.u32 4294901760, %v2765_v16  ;;  %v2793_v28 = vand.u32 4294901760, %v35_v18 }
   0x7   :  { %301 = vmatpush.msra.mxu3 %v2731_v4  ;;  %v4210_v27 = vand.u32 4294901760, %v2773_v19  ;;  %v2796_v29 = vsub.f32 %v37_v12, %v2767_v17  ;;  %v4209_v33 = vand.u32 4294901760, %v2776_v20  ;;  %v2814_v35 = vand.u32 4294901760, %v34_v26 }
   0x8   :  { %107 = vmatpush.msra.mxu0 %v2733_v5  ;;  %249 = vmatpush.msra.mxu2 %v2761_v15  ;;  %v146_v30 = vsub.f32 %v2758_v14, %v145_v22  ;;  %v152_v31 = vsub.f32 %v2761_v15, %v4214_v23  ;;  %v158_v32 = vsub.f32 %v2765_v16, %v4212_v24  ;;  %v4207_v36 = vand.u32 4294901760, %v2779_v21 }
   0x9   :  { %303 = vmatpush.msra.mxu3 %v2733_v5 }
   0xa   :  { %12 = vsyncpa [#allocation3], 0  ;;  %109 = vmatpush.msra.mxu0 %v2744_v9  ;;  %v147_v37 = vand.u32 4294901760, %v146_v30  ;;  %252 = vmatpush.msra.mxu2 %v2765_v16  ;;  %v153_v38 = vand.u32 4294901760, %v152_v31  ;;  %v164_v39 = vsub.f32 %v2773_v19, %v4210_v27  ;;  %v2823_v40 = vsub.f32 %v36_v13, %v2786_v25  ;;  %v32_v42 = vld [vmem:[%s4197_s5 + $0x20] sm:$0xff]  ;;  %v31_v48 = vld [vmem:[%s4197_s5 + $0x18] sm:$0xff] }
   0xb   :  { %305 = vmatpush.msra.mxu3 %v2744_v9  ;;  %v2826_v41 = vand.u32 4294901760, %v33_v34  ;;  %v159_v43 = vand.u32 4294901760, %v158_v32  ;;  %v170_v44 = vsub.f32 %v2776_v20, %v4209_v33  ;;  %v4206_v45 = vand.u32 4294901760, %v2796_v29  ;;  %v30_v54 = vld [vmem:[%s4197_s5 + $0x10] sm:$0xff]  ;;  %v2865_v55 = vld [vmem:[%s4192_s0] sm:$0xff]  ;;  %v59_v60 = vld [vmem:[%s4197_s5 + $0xf8] sm:$0xff] }
   0xc   :  { %111 = vmatpush.msra.mxu0 %v2746_v10  ;;  %148 = vmatpush.msra.mxu1 %v147_v37  ;;  %v2837_v46 = vsub.f32 %v35_v18, %v2793_v28  ;;  %v176_v47 = vsub.f32 %v2779_v21, %v4207_v36  ;;  %v165_v49 = vand.u32 4294901760, %v164_v39  ;;  %v2848_v50 = vand.u32 4294901760, %v32_v42  ;;  %4245 = vst [vmem:[#allocation5_spill] sm:$0xff] %v2865_v55  ;;  %v29_v62 = vld [vmem:[%s4197_s5 + $0x8] sm:$0xff]  ;;  %v28_v6 = vld [vmem:[%s4197_s5] sm:$0xff]  ;;  %v58_v7 = vld [vmem:[%s4197_s5 + $0xf0] sm:$0xff] }
   0xd   :  { %255 = vmatpush.msra.mxu2 %v2773_v19  ;;  %307 = vmatpush.msra.mxu3 %v2746_v10  ;;  %v4205_v51 = vand.u32 4294901760, %v2823_v40  ;;  %v2852_v52 = vsub.f32 %v34_v26, %v2814_v35  ;;  %v2857_v53 = vsub.f32 %v33_v34, %v2826_v41  ;;  %v171_v56 = vand.u32 4294901760, %v170_v44  ;;  %93 = vst [vmem:[#allocation1] ss:$4 sm:$0xff] %v2865_v55  ;;  %v57_v34 = vld [vmem:[%s4197_s5 + $0xe8] sm:$0xff]  ;;  %v52_v36 = vld [vmem:[%s4197_s5 + $0xc0] sm:$0xff] }
   0xe   :  { %113 = vmatpush.msra.mxu0 %v2748_v11  ;;  %154 = vmatpush.msra.mxu1 %v153_v38  ;;  %v182_v57 = vsub.f32 %v2796_v29, %v4206_v45  ;;  %v2871_v58 = vand.u32 4294901760, %v31_v48  ;;  %v4203_v59 = vand.u32 4294901760, %v2837_v46  ;;  %v177_v61 = vand.u32 4294901760, %v176_v47  ;;  %v56_v47 = vld [vmem:[%s4197_s5 + $0xe0] sm:$0xff] }
   0xf   :  { %258 = vmatpush.msra.mxu2 %v2776_v20  ;;  %309 = vmatpush.msra.mxu3 %v2748_v11  ;;  %v188_v63 = vsub.f32 %v2823_v40, %v4205_v51  ;;  %v2887_v0 = vand.u32 4294901760, %v30_v54  ;;  %v4202_v1 = vand.u32 4294901760, %v2852_v52  ;;  %v2891_v2 = vsub.f32 %v32_v42, %v2848_v50 }
  0x10   :  { %115 = vmatpush.msra.mxu0 %v2767_v17  ;;  %160 = vmatpush.msra.mxu1 %v159_v43  ;;  %v4201_v8 = vand.u32 4294901760, %v2857_v53  ;;  %v2902_v12 = vand.u32 4294901760, %v59_v60  ;;  %v183_v13 = vand.u32 4294901760, %v182_v57  ;;  %v194_v18 = vsub.f32 %v2837_v46, %v4203_v59 }
  0x11   :  { %261 = vmatpush.msra.mxu2 %v2779_v21  ;;  %311 = vmatpush.msra.mxu3 %v2767_v17  ;;  %v2908_v26 = vand.u32 4294901760, %v29_v62  ;;  %v2911_v30 = vsub.f32 %v31_v48, %v2871_v58  ;;  %v2915_v31 = vand.u32 4294901760, %v28_v6  ;;  %v2917_v32 = vand.u32 4294901760, %v58_v7 }
  0x12   :  { %117 = vmatpush.msra.mxu0 %v2786_v25  ;;  %166 = vmatpush.msra.mxu1 %v165_v49  ;;  %v189_v37 = vand.u32 4294901760, %v188_v63  ;;  %v200_v38 = vsub.f32 %v2852_v52, %v4202_v1  ;;  %v4200_v39 = vand.u32 4294901760, %v2891_v2  ;;  %v2928_v42 = vsub.f32 %v30_v54, %v2887_v0  ;;  %v53_v1 = vld [vmem:[%s4197_s5 + $0xc8] sm:$0xff] }
  0x13   :  { %264 = vmatpush.msra.mxu2 %v2796_v29  ;;  %313 = vmatpush.msra.mxu3 %v2786_v25  ;;  %v206_v43 = vsub.f32 %v2857_v53, %v4201_v8  ;;  %v2936_v44 = vsub.f32 %v59_v60, %v2902_v12  ;;  %v195_v48 = vand.u32 4294901760, %v194_v18  ;;  %v4204_v49 = vand.u32 4294901760, %v2911_v30 }
  0x14   :  { %119 = vmatpush.msra.mxu0 %v2793_v28  ;;  %172 = vmatpush.msra.mxu1 %v171_v56  ;;  %v2944_v54 = vsub.f32 %v29_v62, %v2908_v26  ;;  %v2946_v56 = vand.u32 4294901760, %v57_v34  ;;  %v2951_v57 = vsub.f32 %v28_v6, %v2915_v31  ;;  %v2954_v60 = vsub.f32 %v58_v7, %v2917_v32 }
  0x15   :  { %267 = vmatpush.msra.mxu2 %v2823_v40  ;;  %315 = vmatpush.msra.mxu3 %v2793_v28  ;;  %v201_v62 = vand.u32 4294901760, %v200_v38  ;;  %v212_v63 = vsub.f32 %v2891_v2, %v4200_v39  ;;  %v2964_v18 = vand.u32 4294901760, %v56_v47  ;;  %v207_v6 = vand.u32 4294901760, %v206_v43 }
  0x16   :  { %121 = vmatpush.msra.mxu0 %v2814_v35  ;;  %178 = vmatpush.msra.mxu1 %v177_v61  ;;  %4246 = vst [vmem:[#allocation6_spill] sm:$0xff] %v2946_v56  ;;  %v55_v61 = vld [vmem:[%s4197_s5 + $0xd8] sm:$0xff]  ;;  %v4211_v7 = vand.u32 4294901760, %v2936_v44  ;;  %v218_v38 = vsub.f32 %v2911_v30, %v4204_v49  ;;  %v4213_v39 = vand.u32 4294901760, %v2944_v54  ;;  %v2978_v8 = vsub.f32 %v57_v34, %v2946_v56 }
  0x17   :  { %270 = vmatpush.msra.mxu2 %v2837_v46  ;;  %317 = vmatpush.msra.mxu3 %v2814_v35  ;;  %v2980_v43 = vand.u32 4294901760, %v55_v61  ;;  %v4215_v59 = vand.u32 4294901760, %v2954_v60  ;;  %v213_v49 = vand.u32 4294901760, %v212_v63  ;;  %v2994_v51 = vsub.f32 %v56_v47, %v2964_v18 }
  0x18   :  { %123 = vmatpush.msra.mxu0 %v2826_v41  ;;  %184 = vmatpush.msra.mxu1 %v183_v13  ;;  %v4208_v13 = vand.u32 4294901760, %v2928_v42  ;;  %v3006_v63 = vand.u32 4294901760, %v53_v1  ;;  %v219_v47 = vand.u32 4294901760, %v218_v38  ;;  %v3021_v24 = vand.u32 4294901760, %v52_v36 }
  0x19   :  { %273 = vmatpush.msra.mxu2 %v2852_v52  ;;  %319 = vmatpush.msra.mxu3 %v2826_v41  ;;  %v3014_v27 = vsub.f32 %v55_v61, %v2980_v43  ;;  %vm1472_vm0 = vcmask 261120   ;;  %vm1634_vm1 = vcmask 15360   ;;  %vm2620_vm6 = vcmask 1041408  }
  0x1a   :  { %125 = vmatpush.msra.mxu0 %v2848_v50  ;;  %190 = vmatpush.msra.mxu1 %v189_v37  ;;  %v54_v37 = vld [vmem:[%s4197_s5 + $0xd0] sm:$0xff]  ;;  %v224_v34 = vsub.f32 %v2928_v42, %v4208_v13  ;;  %v230_v13 = vsub.f32 %v2944_v54, %v4213_v39  ;;  %v3038_v33 = vsub.f32 %v53_v1, %v3006_v63  ;;  %vm2622_vm7 = vcmask 1045508  }
  0x1b   :  { %276 = vmatpush.msra.mxu2 %v2857_v53  ;;  %321 = vmatpush.msra.mxu3 %v2848_v50  ;;  %v2996_v45 = vand.u32 4294901760, %v54_v37  ;;  %v3054_v39 = vsub.f32 %v52_v36, %v3021_v24  ;;  %vm2624_vm8 = vcmask 1043456  }
  0x1c   :  { %127 = vmatpush.msra.mxu0 %v2871_v58  ;;  %196 = vmatpush.msra.mxu1 %v195_v48  ;;  %v4216_v48 = vand.u32 4294901760, %v2951_v57  ;;  %v225_v38 = vand.u32 4294901760, %v224_v34  ;;  %v231_v34 = vand.u32 4294901760, %v230_v13  ;;  %v49_v13 = vld [vmem:[%s4197_s5 + $0xa8] sm:$0xff] }
  0x1d   :  { %279 = vmatpush.msra.mxu2 %v2891_v2  ;;  %323 = vmatpush.msra.mxu3 %v2871_v58  ;;  %v3032_v23 = vsub.f32 %v54_v37, %v2996_v45  ;;  %v4247_v37 = vand.u32 4294901760, %v2978_v8 }
  0x1e   :  { %129 = vmatpush.msra.mxu0 %v2887_v0  ;;  %202 = vmatpush.msra.mxu1 %v201_v62  ;;  %v487_v62 = vsub.f32 %v2936_v44, %v4211_v7  ;;  %v493_v7 = vsub.f32 %v2954_v60, %v4215_v59  ;;  %v236_v61 = vsub.f32 %v2951_v57, %v4216_v48 }
  0x1f   :  { %282 = vmatpush.msra.mxu2 %v2911_v30  ;;  %325 = vmatpush.msra.mxu3 %v2887_v0  ;;  %v499_v48 = vsub.f32 %v2978_v8, %v4247_v37  ;;  %v4249_v37 = vand.u32 4294901760, %v2994_v51 }
  0x20   :  { %131 = vmatpush.msra.mxu0 %v2908_v26  ;;  %208 = vmatpush.msra.mxu1 %v207_v6  ;;  %v51_v6 = vld [vmem:[%s4197_s5 + $0xb8] sm:$0xff]  ;;  %v488_v59 = vand.u32 4294901760, %v487_v62  ;;  %v4248_v62 = vand.u32 4294901760, %v2761_v15  ;;  %v494_v1 = vand.u32 4294901760, %v493_v7  ;;  %v4250_v7 = vand.u32 4294901760, %v2765_v16 }
  0x21   :  { %285 = vmatpush.msra.mxu2 %v2928_v42  ;;  %327 = vmatpush.msra.mxu3 %v2908_v26  ;;  %v505_v14 = vsub.f32 %v2994_v51, %v4249_v37  ;;  %v4251_v37 = vand.u32 4294901760, %v3014_v27  ;;  %v3079_v16 = vand.u32 4294901760, %v49_v13 }
  0x22   :  { %133 = vmatpush.msra.mxu0 %v2915_v31  ;;  %214 = vmatpush.msra.mxu1 %v213_v49  ;;  %v50_v49 = vld [vmem:[%s4197_s5 + $0xb0] sm:$0xff] }
  0x23   :  { %288 = vmatpush.msra.mxu2 %v2944_v54  ;;  %329 = vmatpush.msra.mxu3 %v2915_v31  ;;  %v511_v15 = vsub.f32 %v3014_v27, %v4251_v37  ;;  %v4253_v37 = vand.u32 4294901760, %v3032_v23 }
  0x24   :  { %340 = vmatpush.msrb.mxu0 %v145_v22  ;;  %220 = vmatpush.msra.mxu1 %v219_v47  ;;  %v3048_v22 = vand.u32 4294901760, %v51_v6  ;;  %v237_v47 = vand.u32 4294901760, %v236_v61  ;;  %v500_v61 = vand.u32 4294901760, %v499_v48  ;;  %v506_v48 = vand.u32 4294901760, %v505_v14 }
  0x25   :  { %291 = vmatpush.msra.mxu2 %v2951_v57  ;;  %489 = vmatpush.msrb.mxu3 %v488_v59  ;;  %v4252_v59 = vand.u32 4294901760, %v2773_v19  ;;  %v512_v14 = vand.u32 4294901760, %v511_v15  ;;  %v46_v15 = vld [vmem:[%s4197_s5 + $0x90] sm:$0xff] }
  0x26   :  { %344 = vmatpush.msrb.mxu0 %v4248_v62  ;;  %226 = vmatpush.msra.mxu1 %v225_v38  ;;  %v3064_v62 = vand.u32 4294901760, %v50_v49  ;;  %v48_v38 = vld [vmem:[%s4197_s5 + $0xa0] sm:$0xff]  ;;  %v3077_v55 = vsub.f32 %v51_v6, %v3048_v22  ;;  %v517_v6 = vsub.f32 %v3032_v23, %v4253_v37 }
  0x27   :  { %444 = vmatpush.msrb.mxu2 %v2902_v12  ;;  %495 = vmatpush.msrb.mxu3 %v494_v1  ;;  %v3094_v19 = vand.u32 4294901760, %v48_v38  ;;  %v4254_v1 = vand.u32 4294901760, %v2776_v20  ;;  %v4256_v20 = vand.u32 4294901760, %v2779_v21 }
  0x28   :  { %348 = vmatpush.msrb.mxu0 %v4250_v7  ;;  %232 = vmatpush.msra.mxu1 %v231_v34  ;;  %v47_v34 = vld [vmem:[%s4197_s5 + $0x98] sm:$0xff]  ;;  %v3092_v36 = vsub.f32 %v50_v49, %v3064_v62  ;;  %v94_v7 = vld.sshfl [vmem:[#allocation1] sm:$0xff pattern:$0x73625140]  ;;  %v4220_v37 = vand.u32 4294901760, %v3077_v55  ;;  %v3105_v49 = vsub.f32 %v49_v13, %v3079_v16  ;;  %v518_v13 = vand.u32 4294901760, %v517_v6 }
  0x29   :  { %446 = vmatpush.msrb.mxu2 %v2917_v32  ;;  %501 = vmatpush.msrb.mxu3 %v500_v61  ;;  %v3123_v21 = vand.u32 4294901760, %v94_v7  ;;  %v3136_v6 = vand.u32 4294901760, %v46_v15 }
  0x2a   :  { %352 = vmatpush.msrb.mxu0 %v4252_v59  ;;  %238 = vmatpush.msra.mxu1 %v237_v47  ;;  %v4255_v59 = vand.u32 4294901760, %v3038_v33  ;;  %v4221_v61 = vand.u32 4294901760, %v3092_v36 }
  0x2b   :  { %448 = vmatpush.msrb.mxu2 %v2946_v56  ;;  %v3107_v56 = vand.u32 4294901760, %v47_v34  ;;  %507 = vmatpush.msrb.mxu3 %v506_v48  ;;  %v546_v48 = vand.u32 4294901760, %v3105_v49 }
  0x2c   :  { %356 = vmatpush.msrb.mxu0 %v4254_v1  ;;  %407 = vmatpush.msrb.mxu1 %v2729_v3  ;;  %v523_v47 = vsub.f32 %v3038_v33, %v4255_v59  ;;  %v4257_v3 = vand.u32 4294901760, %v3054_v39  ;;  %v3121_v59 = vsub.f32 %v48_v38, %v3094_v19  ;;  %v535_v38 = vsub.f32 %v3077_v55, %v4220_v37 }
  0x2d   :  { %450 = vmatpush.msrb.mxu2 %v2964_v18  ;;  %513 = vmatpush.msrb.mxu3 %v512_v14  ;;  %v541_v14 = vsub.f32 %v3092_v36, %v4221_v61  ;;  %v3150_v37 = vsub.f32 %v94_v7, %v3123_v21  ;;  %v547_v7 = vsub.f32 %v3105_v49, %v546_v48  ;;  %v4261_v61 = vand.u32 4294901760, %v2852_v52 }
  0x2e   :  { %360 = vmatpush.msrb.mxu0 %v4256_v20  ;;  %409 = vmatpush.msrb.mxu1 %v2731_v4  ;;  %v529_v1 = vsub.f32 %v3054_v39, %v4257_v3  ;;  %v4258_v4 = vand.u32 4294901760, %v2796_v29  ;;  %v524_v20 = vand.u32 4294901760, %v523_v47  ;;  %v45_v3 = vld [vmem:[%s4197_s5 + $0x88] sm:$0xff]  ;;  %v3139_v29 = vsub.f32 %v47_v34, %v3107_v56 }
  0x2f   :  { %452 = vmatpush.msrb.mxu2 %v2980_v43  ;;  %519 = vmatpush.msrb.mxu3 %v518_v13  ;;  %v3152_v34 = vand.u32 4294901760, %v45_v3  ;;  %v4262_v52 = vand.u32 4294901760, %v2857_v53 }
  0x30   :  { %364 = vmatpush.msrb.mxu0 %v4258_v4  ;;  %411 = vmatpush.msrb.mxu1 %v2733_v5  ;;  %v4259_v5 = vand.u32 4294901760, %v2823_v40  ;;  %v530_v47 = vand.u32 4294901760, %v529_v1  ;;  %v552_v4 = vand.u32 4294901760, %v3121_v59  ;;  %v44_v40 = vld [vmem:[%s4197_s5 + $0x80] sm:$0xff]  ;;  %v536_v1 = vand.u32 4294901760, %v535_v38 }
  0x31   :  { %454 = vmatpush.msrb.mxu2 %v2996_v45  ;;  %525 = vmatpush.msrb.mxu3 %v524_v20  ;;  %v558_v13 = vand.u32 4294901760, %v3139_v29  ;;  %v136_v38 = vand.u32 4294901760, %v3150_v37 }
  0x32   :  { %368 = vmatpush.msrb.mxu0 %v4259_v5  ;;  %413 = vmatpush.msrb.mxu1 %v2744_v9  ;;  %v4260_v9 = vand.u32 4294901760, %v2837_v46  ;;  %v3166_v5 = vsub.f32 %v46_v15, %v3136_v6  ;;  %v3171_v46 = vand.u32 4294901760, %v44_v40  ;;  %v553_v20 = vsub.f32 %v3121_v59, %v552_v4 }
  0x33   :  { %456 = vmatpush.msrb.mxu2 %v3006_v63  ;;  %531 = vmatpush.msrb.mxu3 %v530_v47  ;;  %v3179_v15 = vsub.f32 %v45_v3, %v3152_v34  ;;  %v559_v47 = vsub.f32 %v3139_v29, %v558_v13  ;;  %v137_v3 = vsub.f32 %v3150_v37, %v136_v38 }
  0x34   :  { %372 = vmatpush.msrb.mxu0 %v4260_v9  ;;  %415 = vmatpush.msrb.mxu1 %v2746_v10  ;;  %v542_v10 = vand.u32 4294901760, %v541_v14  ;;  %v564_v14 = vand.u32 4294901760, %v3166_v5  ;;  %v4263_v9 = vand.u32 4294901760, %v2891_v2  ;;  %v3193_v53 = vsub.f32 %v44_v40, %v3171_v46 }
  0x35   :  { %458 = vmatpush.msrb.mxu2 %v3021_v24  ;;  %537 = vmatpush.msrb.mxu3 %v536_v1  ;;  %v570_v1 = vand.u32 4294901760, %v3179_v15  ;;  %v4265_v40 = vand.u32 4294901760, %v2928_v42  ;;  %v4267_v42 = vand.u32 4294901760, %v2951_v57 }
  0x36   :  { %376 = vmatpush.msrb.mxu0 %v4261_v61  ;;  %417 = vmatpush.msrb.mxu1 %v2748_v11  ;;  %v95_v11 = vld.sshfl [vmem:[#allocation1 + $0x8] sm:$0xff pattern:$0x73625140]  ;;  %v548_v61 = vand.u32 4294901760, %v547_v7  ;;  %v565_v2 = vsub.f32 %v3166_v5, %v564_v14 }
  0x37   :  { %460 = vmatpush.msrb.mxu2 %v3048_v22  ;;  %543 = vmatpush.msrb.mxu3 %v542_v10  ;;  %v3198_v7 = vand.u32 4294901760, %v95_v11  ;;  %v576_v10 = vand.u32 4294901760, %v3193_v53 }
  0x38   :  { %380 = vmatpush.msrb.mxu0 %v4262_v52  ;;  %419 = vmatpush.msrb.mxu1 %v2767_v17  ;;  %v554_v17 = vand.u32 4294901760, %v553_v20  ;;  %v4264_v52 = vand.u32 4294901760, %v2911_v30  ;;  %v138_v30 = vand.u32 4294901760, %v137_v3 }
  0x39   :  { %462 = vmatpush.msrb.mxu2 %v3064_v62  ;;  %549 = vmatpush.msrb.mxu3 %v548_v61  ;;  %v3216_v20 = vsub.f32 %v95_v11, %v3198_v7  ;;  %v4266_v61 = vand.u32 4294901760, %v2944_v54 }
  0x3a   :  { %384 = vmatpush.msrb.mxu0 %v4263_v9  ;;  %421 = vmatpush.msrb.mxu1 %v2786_v25  ;;  %v560_v25 = vand.u32 4294901760, %v559_v47  ;;  %v577_v47 = vsub.f32 %v3193_v53, %v576_v10 }
  0x3b   :  { %464 = vmatpush.msrb.mxu2 %v3079_v16  ;;  %555 = vmatpush.msrb.mxu3 %v554_v17  ;;  %v477_v11 = vand.u32 4294901760, %v3216_v20  ;;  %v66_v17 = vld [vmem:[%s4197_s5 + $0x130] sm:$0xff] }
  0x3c   :  { %388 = vmatpush.msrb.mxu0 %v4264_v52  ;;  %423 = vmatpush.msrb.mxu1 %v2793_v28  ;;  %v571_v28 = vsub.f32 %v3179_v15, %v570_v1 }
  0x3d   :  { %466 = vmatpush.msrb.mxu2 %v3094_v19  ;;  %561 = vmatpush.msrb.mxu3 %v560_v25 }
  0x3e   :  { %392 = vmatpush.msrb.mxu0 %v4265_v40  ;;  %425 = vmatpush.msrb.mxu1 %v2814_v35  ;;  %v566_v35 = vand.u32 4294901760, %v565_v2  ;;  %v572_v54 = vand.u32 4294901760, %v571_v28  ;;  %v64_v28 = vld [vmem:[%s4197_s5 + $0x120] sm:$0xff] }
  0x3f   :  { %468 = vmatpush.msrb.mxu2 %v3107_v56  ;;  %139 = vmatmul.f32.vlgmr.msra.gmra.mxu0 %v138_v30 }
  0x40   :  { %396 = vmatpush.msrb.mxu0 %v4266_v61  ;;  %427 = vmatpush.msrb.mxu1 %v2826_v41  ;;  %v578_v41 = vand.u32 4294901760, %v577_v47  ;;  %v96_v47 = vld.sshfl [vmem:[#allocation1 + $0x10] sm:$0xff pattern:$0x73625140] }
  0x41   :  { %470 = vmatpush.msrb.mxu2 %v3136_v6  ;;  %567 = vmatpush.msrb.mxu3 %v566_v35 }
  0x42   :  { %400 = vmatpush.msrb.mxu0 %v4267_v42  ;;  %429 = vmatpush.msrb.mxu1 %v2848_v50  ;;  %v478_v50 = vsub.f32 %v3216_v20, %v477_v11 }
  0x43   :  { %472 = vmatpush.msrb.mxu2 %v3152_v34  ;;  %573 = vmatpush.msrb.mxu3 %v572_v54 }
  0x44   :  { %587 = vmatpush.msra.mxu0 %v2936_v44  ;;  %431 = vmatpush.msrb.mxu1 %v2871_v58  ;;  %v4268_v58 = vand.u32 4294901760, %v2936_v44  ;;  %v479_v57 = vand.u32 4294901760, %v478_v50  ;;  %v4270_v44 = vand.u32 4294901760, %v2978_v8  ;;  %v3454_v50 = vand.u32 4294901760, %v64_v28 }
  0x45   :  { %294 = vmatmul.f32.vlgmr.msra.gmra.mxu2 %v3150_v37  ;;  %333 = vmatmul.f32.vlgmr.msra.gmra.mxu3 %v136_v38  ;;  %v67_v38 = vld [vmem:[%s4197_s5 + $0x138] sm:$0xff] }
  0x46   :  { %590 = vmatpush.msra.mxu0 %v2954_v60  ;;  %433 = vmatpush.msrb.mxu1 %v2887_v0  ;;  %v4269_v0 = vand.u32 4294901760, %v2954_v60  ;;  %v4272_v60 = vld [vmem:[#allocation6_spill] sm:$0xff]  ;;  %v3408_v52 = vand.u32 4294901760, %v67_v38 }
  0x47   :  { %474 = vmatpush.msrb.mxu2 %v3171_v46  ;;  %579 = vmatpush.msrb.mxu3 %v578_v41 }
  0x48   :  { %593 = vmatpush.msra.mxu0 %v2978_v8  ;;  %435 = vmatpush.msrb.mxu1 %v2908_v26  ;;  %v4271_v26 = vand.u32 4294901760, %v2994_v51  ;;  %v4273_v8 = vand.u32 4294901760, %v3014_v27 }
  0x49   :  { %681 = vmatpush.msra.mxu2 %v4268_v58  ;;  %240 = vmatmul.f32.vlgmr.msra.gmra.mxu1 %v3123_v21 }
  0x4a   :  { %596 = vmatpush.msra.mxu0 %v2994_v51  ;;  %748 = vmatpush.msra.mxu3 %v2902_v12  ;;  %v4274_v51 = vand.u32 4294901760, %v3032_v23 }
  0x4b   :  { %685 = vmatpush.msra.mxu2 %v4269_v0  ;;  %437 = vmatpush.msrb.mxu1 %v2915_v31  ;;  %v4278_v31 = vand.u32 4294901760, %v3092_v36 }
  0x4c   :  { %599 = vmatpush.msra.mxu0 %v3014_v27  ;;  %750 = vmatpush.msra.mxu3 %v2917_v32  ;;  %v4275_v27 = vand.u32 4294901760, %v3038_v33 }
  0x4d   :  { %640 = vmatpush.msra.mxu1 %v2902_v12  ;;  %689 = vmatpush.msra.mxu2 %v4270_v44  ;;  %v4276_v12 = vand.u32 4294901760, %v3054_v39  ;;  %v62_v44 = vld [vmem:[%s4197_s5 + $0x110] sm:$0xff] }
  0x4e   :  { %480 = vmatmul.f32.vlgmr.msrb.gmra.mxu2 %v479_v57  ;;  %602 = vmatpush.msra.mxu0 %v3032_v23  ;;  %v75_v23 = vld [vmem:[%s4197_s5 + $0x178] sm:$0xff] }
  0x4f   :  { %642 = vmatpush.msra.mxu1 %v2917_v32  ;;  %693 = vmatpush.msra.mxu2 %v4271_v26  ;;  %v3298_v32 = vand.u32 4294901760, %v75_v23  ;;  %v3465_v26 = vand.u32 4294901760, %v96_v47 }
  0x50   :  { %752 = vmatpush.msra.mxu3 %v4272_v60  ;;  %402 = vmatmul.f32.vlgmr.msrb.gmra.mxu0 %v3123_v21 }
  0x51   :  { %581 = vmatmul.f32.vlgmr.msrb.gmra.mxu3 %v3198_v7  ;;  %605 = vmatpush.msra.mxu0 %v3038_v33  ;;  %v4277_v33 = vand.u32 4294901760, %v3077_v55 }
  0x52   :  { %644 = vmatpush.msra.mxu1 %v4272_v60  ;;  %697 = vmatpush.msra.mxu2 %v4273_v8 }
  0x53   :  { %754 = vmatpush.msra.mxu3 %v2964_v18  ;;  %439 = vmatmul.f32.vlgmr.msrb.gmra.mxu1 %v3123_v21 }
  0x54   :  { %608 = vmatpush.msra.mxu0 %v3054_v39  ;;  %646 = vmatpush.msra.mxu1 %v2964_v18  ;;  %v72_v39 = vld [vmem:[%s4197_s5 + $0x160] sm:$0xff] }
  0x55   :  { %701 = vmatpush.msra.mxu2 %v4274_v51  ;;  %756 = vmatpush.msra.mxu3 %v2980_v43 }
  0x56   :  { %611 = vmatpush.msra.mxu0 %v3077_v55  ;;  %648 = vmatpush.msra.mxu1 %v2980_v43  ;;  %v73_v55 = vld [vmem:[%s4197_s5 + $0x168] sm:$0xff]  ;;  %v3321_v43 = vsub.f32 %v75_v23, %v3298_v32 }
  0x57   :  { %705 = vmatpush.msra.mxu2 %v4275_v27  ;;  %758 = vmatpush.msra.mxu3 %v2996_v45  ;;  %v3318_v18 = vand.u32 4294901760, %v73_v55 }
  0x58   :  { %614 = vmatpush.msra.mxu0 %v3092_v36  ;;  %650 = vmatpush.msra.mxu1 %v2996_v45  ;;  %v74_v45 = vld [vmem:[%s4197_s5 + $0x170] sm:$0xff] }
  0x59   :  { %709 = vmatpush.msra.mxu2 %v4276_v12  ;;  %760 = vmatpush.msra.mxu3 %v3006_v63  ;;  %v70_v36 = vld [vmem:[%s4197_s5 + $0x150] sm:$0xff] }
  0x5a   :  { %617 = vmatpush.msra.mxu0 %v3105_v49  ;;  %652 = vmatpush.msra.mxu1 %v3006_v63  ;;  %v71_v63 = vld [vmem:[%s4197_s5 + $0x158] sm:$0xff]  ;;  %v3348_v49 = vsub.f32 %v73_v55, %v3318_v18  ;;  %v61_v55 = vld [vmem:[%s4197_s5 + $0x108] sm:$0xff] }
  0x5b   :  { %713 = vmatpush.msra.mxu2 %v4277_v33  ;;  %762 = vmatpush.msra.mxu3 %v3021_v24  ;;  %v3341_v37 = vand.u32 4294901760, %v71_v63  ;;  %v3483_v33 = vand.u32 4294901760, %v62_v44 }
  0x5c   :  { %620 = vmatpush.msra.mxu0 %v3121_v59  ;;  %654 = vmatpush.msra.mxu1 %v3021_v24  ;;  %v3308_v24 = vand.u32 4294901760, %v74_v45  ;;  %v3352_v59 = vand.u32 4294901760, %v70_v36 }
  0x5d   :  { %717 = vmatpush.msra.mxu2 %v4278_v31  ;;  %764 = vmatpush.msra.mxu3 %v3048_v22  ;;  %v3487_v31 = vsub.f32 %v64_v28, %v3454_v50 }
  0x5e   :  { %623 = vmatpush.msra.mxu0 %v3139_v29  ;;  %656 = vmatpush.msra.mxu1 %v3048_v22  ;;  %v3331_v22 = vand.u32 4294901760, %v72_v39  ;;  %v68_v29 = vld [vmem:[%s4197_s5 + $0x140] sm:$0xff] }
  0x5f   :  { %721 = vmatpush.msra.mxu2 %v546_v48  ;;  %766 = vmatpush.msra.mxu3 %v3064_v62 }
  0x60   :  { %626 = vmatpush.msra.mxu0 %v3166_v5  ;;  %658 = vmatpush.msra.mxu1 %v3064_v62  ;;  %v3334_v62 = vsub.f32 %v74_v45, %v3308_v24  ;;  %v3362_v48 = vsub.f32 %v72_v39, %v3331_v22  ;;  %v3384_v5 = vsub.f32 %v70_v36, %v3352_v59 }
  0x61   :  { %725 = vmatpush.msra.mxu2 %v552_v4  ;;  %768 = vmatpush.msra.mxu3 %v3079_v16  ;;  %v3495_v39 = vsub.f32 %v96_v47, %v3465_v26 }
  0x62   :  { %629 = vmatpush.msra.mxu0 %v3179_v15  ;;  %660 = vmatpush.msra.mxu1 %v3079_v16  ;;  %v827_v16 = vand.u32 4294901760, %v3321_v43  ;;  %v833_v21 = vand.u32 4294901760, %v3334_v62  ;;  %v4235_v9 = vand.u32 4294901760, %v3362_v48  ;;  %v4230_v25 = vand.u32 4294901760, %v3384_v5 }
  0x63   :  { %729 = vmatpush.msra.mxu2 %v558_v13  ;;  %770 = vmatpush.msra.mxu3 %v3094_v19 }
  0x64   :  { %632 = vmatpush.msra.mxu0 %v3193_v53  ;;  %662 = vmatpush.msra.mxu1 %v3094_v19  ;;  %v69_v19 = vld [vmem:[%s4197_s5 + $0x148] sm:$0xff]  ;;  %v828_v4 = vsub.f32 %v3321_v43, %v827_v16  ;;  %v834_v15 = vsub.f32 %v3334_v62, %v833_v21  ;;  %v846_v40 = vsub.f32 %v3362_v48, %v4235_v9 }
  0x65   :  { %733 = vmatpush.msra.mxu2 %v564_v14  ;;  %772 = vmatpush.msra.mxu3 %v3107_v56  ;;  %v3378_v13 = vand.u32 4294901760, %v69_v19  ;;  %v3394_v14 = vand.u32 4294901760, %v68_v29  ;;  %v858_v54 = vsub.f32 %v3384_v5, %v4230_v25 }
  0x66   :  { %635 = vmatmul.f32.vlgmr.msra.gmra.mxu0 %v3216_v20  ;;  %664 = vmatpush.msra.mxu1 %v3107_v56  ;;  %v3367_v56 = vsub.f32 %v71_v63, %v3341_v37  ;;  %v829_v3 = vand.u32 4294901760, %v828_v4  ;;  %v835_v2 = vand.u32 4294901760, %v834_v15  ;;  %v3443_v20 = vsub.f32 %v67_v38, %v3408_v52  ;;  %v91_v4 = vld [vmem:[%s4197_s5 + $0x1f8] sm:$0xff]  ;;  %v60_v15 = vld [vmem:[%s4197_s5 + $0x100] sm:$0xff] }
  0x67   :  { %785 = vmatpush.msrb.mxu0 %v3298_v32  ;;  %737 = vmatpush.msra.mxu2 %v570_v1  ;;  %v3427_v30 = vsub.f32 %v68_v29, %v3394_v14  ;;  %v847_v41 = vand.u32 4294901760, %v846_v40  ;;  %v859_v12 = vand.u32 4294901760, %v858_v54  ;;  %v3510_v38 = vand.u32 4294901760, %v61_v55 }
  0x68   :  { %774 = vmatpush.msra.mxu3 %v3136_v6  ;;  %666 = vmatpush.msra.mxu1 %v3136_v6  ;;  %v839_v6 = vand.u32 4294901760, %v3348_v49  ;;  %v4232_v53 = vand.u32 4294901760, %v3367_v56  ;;  %v4226_v51 = vand.u32 4294901760, %v3443_v20  ;;  %v3526_v40 = vand.u32 4294901760, %v91_v4 }
  0x69   :  { %787 = vmatpush.msrb.mxu0 %v3308_v24  ;;  %741 = vmatpush.msra.mxu2 %v576_v10  ;;  %v3424_v10 = vand.u32 4294901760, %v66_v17  ;;  %v4227_v58 = vand.u32 4294901760, %v3427_v30  ;;  %v3535_v47 = vand.u32 4294901760, %v60_v15 }
  0x6a   :  { %776 = vmatpush.msra.mxu3 %v3152_v34  ;;  %743 = vmatmul.f32.vlgmr.msra.gmra.mxu2 %v3198_v7  ;;  %v840_v1 = vsub.f32 %v3348_v49, %v839_v6  ;;  %v876_v36 = vsub.f32 %v3443_v20, %v4226_v51 }
  0x6b   :  { %789 = vmatpush.msrb.mxu0 %v3318_v18  ;;  %928 = vmatpush.msrb.mxu2 %v3321_v43  ;;  %v3458_v0 = vsub.f32 %v66_v17, %v3424_v10  ;;  %v870_v23 = vsub.f32 %v3427_v30, %v4227_v58  ;;  %v83_v43 = vld [vmem:[%s4197_s5 + $0x1b8] sm:$0xff] }
  0x6c   :  { %668 = vmatpush.msra.mxu1 %v3152_v34  ;;  %778 = vmatpush.msra.mxu3 %v3171_v46  ;;  %v3411_v34 = vsub.f32 %v69_v19, %v3378_v13  ;;  %v841_v61 = vand.u32 4294901760, %v840_v1  ;;  %v4222_v1 = vand.u32 4294901760, %v3487_v31  ;;  %v877_v28 = vand.u32 4294901760, %v876_v36 }
  0x6d   :  { %780 = vmatmul.f32.vlgmr.msra.gmra.mxu3 %v3198_v7  ;;  %791 = vmatpush.msrb.mxu0 %v3331_v22  ;;  %v65_v7 = vld [vmem:[%s4197_s5 + $0x128] sm:$0xff]  ;;  %v4225_v45 = vand.u32 4294901760, %v3458_v0  ;;  %v871_v17 = vand.u32 4294901760, %v870_v23  ;;  %v88_v23 = vld [vmem:[%s4197_s5 + $0x1e0] sm:$0xff] }
  0x6e   :  { %931 = vmatpush.msrb.mxu2 %v3334_v62  ;;  %981 = vmatpush.msrb.mxu3 %v3298_v32  ;;  %v3439_v35 = vand.u32 4294901760, %v65_v7  ;;  %v4229_v42 = vand.u32 4294901760, %v3411_v34  ;;  %v82_v62 = vld [vmem:[%s4197_s5 + $0x1b0] sm:$0xff] }
  0x6f   :  { %670 = vmatpush.msra.mxu1 %v3171_v46  ;;  %793 = vmatpush.msrb.mxu0 %v3341_v37  ;;  %v852_v46 = vsub.f32 %v3367_v56, %v4232_v53 }
  0x70   :  { %674 = vmatmul.f32.vlgmr.msra.gmra.mxu1 %v477_v11  ;;  %934 = vmatpush.msrb.mxu2 %v3348_v49  ;;  %v63_v11 = vld [vmem:[%s4197_s5 + $0x118] sm:$0xff]  ;;  %v864_v60 = vsub.f32 %v3411_v34, %v4229_v42  ;;  %v3475_v27 = vsub.f32 %v65_v7, %v3439_v35  ;;  %v3521_v7 = vsub.f32 %v62_v44, %v3483_v33 }
  0x71   :  { %830 = vmatpush.msrb.mxu1 %v829_v3  ;;  %983 = vmatpush.msrb.mxu3 %v3308_v24  ;;  %v853_v57 = vand.u32 4294901760, %v852_v46  ;;  %v3471_v8 = vand.u32 4294901760, %v63_v11  ;;  %v882_v3 = vsub.f32 %v3458_v0, %v4225_v45  ;;  %v90_v46 = vld [vmem:[%s4197_s5 + $0x1f0] sm:$0xff]  ;;  %v894_v44 = vsub.f32 %v3487_v31, %v4222_v1 }
  0x72   :  { %795 = vmatpush.msrb.mxu0 %v3352_v59  ;;  %937 = vmatpush.msrb.mxu2 %v3362_v48  ;;  %v865_v63 = vand.u32 4294901760, %v864_v60  ;;  %v4223_v19 = vand.u32 4294901760, %v3475_v27  ;;  %v4228_v60 = vand.u32 4294901760, %v3521_v7 }
  0x73   :  { %836 = vmatpush.msrb.mxu1 %v835_v2  ;;  %985 = vmatpush.msrb.mxu3 %v3318_v18  ;;  %v3503_v29 = vsub.f32 %v63_v11, %v3471_v8  ;;  %v818_v2 = vand.u32 4294901760, %v3495_v39  ;;  %v3541_v11 = vsub.f32 %v61_v55, %v3510_v38 }
  0x74   :  { %797 = vmatpush.msrb.mxu0 %v3378_v13  ;;  %940 = vmatpush.msrb.mxu2 %v3367_v56 }
  0x75   :  { %842 = vmatpush.msrb.mxu1 %v841_v61  ;;  %987 = vmatpush.msrb.mxu3 %v3331_v22  ;;  %v888_v61 = vsub.f32 %v3475_v27, %v4223_v19  ;;  %v4224_v54 = vand.u32 4294901760, %v3503_v29  ;;  %v819_v55 = vsub.f32 %v3495_v39, %v818_v2  ;;  %v87_v19 = vld [vmem:[%s4197_s5 + $0x1d8] sm:$0xff] }
  0x76   :  { %799 = vmatpush.msrb.mxu0 %v3394_v14  ;;  %943 = vmatpush.msrb.mxu2 %v3384_v5  ;;  %v3591_v58 = vand.u32 4294901760, %v87_v19 }
  0x77   :  { %848 = vmatpush.msrb.mxu1 %v847_v41  ;;  %989 = vmatpush.msrb.mxu3 %v3341_v37  ;;  %v89_v41 = vld [vmem:[%s4197_s5 + $0x1e8] sm:$0xff]  ;;  %v889_v36 = vand.u32 4294901760, %v888_v61  ;;  %v895_v61 = vand.u32 4294901760, %v894_v44  ;;  %v820_v45 = vand.u32 4294901760, %v819_v55 }
  0x78   :  { %801 = vmatpush.msrb.mxu0 %v3408_v52  ;;  %946 = vmatpush.msrb.mxu2 %v3411_v34  ;;  %v3571_v1 = vand.u32 4294901760, %v89_v41 }
  0x79   :  { %854 = vmatpush.msrb.mxu1 %v853_v57  ;;  %991 = vmatpush.msrb.mxu3 %v3352_v59  ;;  %v883_v57 = vand.u32 4294901760, %v882_v3  ;;  %v3569_v3 = vsub.f32 %v60_v15, %v3535_v47  ;;  %v906_v15 = vsub.f32 %v3521_v7, %v4228_v60 }
  0x7a   :  { %803 = vmatpush.msrb.mxu0 %v3424_v10  ;;  %949 = vmatpush.msrb.mxu2 %v3427_v30  ;;  %v3599_v60 = vsub.f32 %v89_v41, %v3571_v1 }
  0x7b   :  { %860 = vmatpush.msrb.mxu1 %v859_v12  ;;  %993 = vmatpush.msrb.mxu3 %v3378_v13  ;;  %v3551_v12 = vand.u32 4294901760, %v90_v46  ;;  %v907_v41 = vand.u32 4294901760, %v906_v15 }
  0x7c   :  { %805 = vmatpush.msrb.mxu0 %v3439_v35  ;;  %952 = vmatpush.msrb.mxu2 %v3443_v20  ;;  %v4236_v15 = vand.u32 4294901760, %v3599_v60 }
  0x7d   :  { %866 = vmatpush.msrb.mxu1 %v865_v63  ;;  %995 = vmatpush.msrb.mxu3 %v3394_v14  ;;  %v3562_v63 = vsub.f32 %v91_v4, %v3526_v40  ;;  %v4231_v4 = vand.u32 4294901760, %v3541_v11 }
  0x7e   :  { %807 = vmatpush.msrb.mxu0 %v3454_v50  ;;  %955 = vmatpush.msrb.mxu2 %v3458_v0 }
  0x7f   :  { %872 = vmatpush.msrb.mxu1 %v871_v17  ;;  %997 = vmatpush.msrb.mxu3 %v3408_v52  ;;  %v900_v17 = vsub.f32 %v3503_v29, %v4224_v54  ;;  %v3586_v54 = vsub.f32 %v90_v46, %v3551_v12  ;;  %v4233_v51 = vand.u32 4294901760, %v3562_v63  ;;  %v4234_v46 = vand.u32 4294901760, %v3569_v3 }
  0x80   :  { %809 = vmatpush.msrb.mxu0 %v3471_v8  ;;  %958 = vmatpush.msrb.mxu2 %v3475_v27  ;;  %v912_v55 = vsub.f32 %v3541_v11, %v4231_v4  ;;  %v3621_v4 = vsub.f32 %v87_v19, %v3591_v58 }
  0x81   :  { %878 = vmatpush.msrb.mxu1 %v877_v28  ;;  %999 = vmatpush.msrb.mxu3 %v3424_v10  ;;  %v3579_v28 = vand.u32 4294901760, %v88_v23  ;;  %v901_v44 = vand.u32 4294901760, %v900_v17  ;;  %v4237_v17 = vand.u32 4294901760, %v3586_v54 }
  0x82   :  { %811 = vmatpush.msrb.mxu0 %v3483_v33  ;;  %961 = vmatpush.msrb.mxu2 %v3487_v31  ;;  %v913_v19 = vand.u32 4294901760, %v912_v55  ;;  %v4239_v9 = vand.u32 4294901760, %v3621_v4 }
  0x83   :  { %884 = vmatpush.msrb.mxu1 %v883_v57  ;;  %1001 = vmatpush.msrb.mxu3 %v3439_v35  ;;  %v86_v57 = vld [vmem:[%s4197_s5 + $0x1d0] sm:$0xff]  ;;  %v3607_v42 = vsub.f32 %v88_v23, %v3579_v28  ;;  %v1169_v23 = vsub.f32 %v3562_v63, %v4233_v51 }
  0x84   :  { %813 = vmatpush.msrb.mxu0 %v3510_v38  ;;  %964 = vmatpush.msrb.mxu2 %v3503_v29  ;;  %v3614_v25 = vand.u32 4294901760, %v86_v57 }
  0x85   :  { %890 = vmatpush.msrb.mxu1 %v889_v36  ;;  %1003 = vmatpush.msrb.mxu3 %v3454_v50  ;;  %v85_v36 = vld [vmem:[%s4197_s5 + $0x1c8] sm:$0xff]  ;;  %v4238_v51 = vand.u32 4294901760, %v3607_v42  ;;  %v1170_v55 = vand.u32 4294901760, %v1169_v23  ;;  %v3665_v23 = vand.u32 4294901760, %v83_v43 }
  0x86   :  { %815 = vmatpush.msrb.mxu0 %v3535_v47  ;;  %967 = vmatpush.msrb.mxu2 %v3521_v7  ;;  %v3632_v53 = vand.u32 4294901760, %v85_v36 }
  0x87   :  { %896 = vmatpush.msrb.mxu1 %v895_v61  ;;  %1005 = vmatpush.msrb.mxu3 %v3471_v8  ;;  %v84_v61 = vld [vmem:[%s4197_s5 + $0x1c0] sm:$0xff]  ;;  %v1187_v49 = vsub.f32 %v3607_v42, %v4238_v51  ;;  %v1193_v51 = vsub.f32 %v3621_v4, %v4239_v9 }
  0x88   :  { %821 = vmatmul.f32.vlgmr.msrb.gmra.mxu0 %v820_v45  ;;  %970 = vmatpush.msrb.mxu2 %v3541_v11  ;;  %v918_v45 = vsub.f32 %v3569_v3, %v4234_v46  ;;  %v3648_v46 = vand.u32 4294901760, %v84_v61 }
  0x89   :  { %1022 = vmatpush.msra.mxu0 %v827_v16  ;;  %902 = vmatpush.msrb.mxu1 %v901_v44  ;;  %v1175_v16 = vsub.f32 %v3586_v54, %v4237_v17  ;;  %v3646_v44 = vsub.f32 %v86_v57, %v3614_v25  ;;  %v1181_v57 = vsub.f32 %v3599_v60, %v4236_v15  ;;  %v3682_v17 = vand.u32 4294901760, %v82_v62 }
  0x8a   :  { %1007 = vmatpush.msrb.mxu3 %v3483_v33  ;;  %973 = vmatpush.msrb.mxu2 %v3569_v3  ;;  %v1194_v9 = vand.u32 4294901760, %v1193_v51  ;;  %v4282_v51 = vand.u32 4294901760, %v3411_v34  ;;  %v77_v34 = vld [vmem:[%s4197_s5 + $0x188] sm:$0xff] }
  0x8b   :  { %1026 = vmatpush.msra.mxu0 %v833_v21  ;;  %908 = vmatpush.msrb.mxu1 %v907_v41  ;;  %v919_v21 = vand.u32 4294901760, %v918_v45  ;;  %v3663_v41 = vsub.f32 %v85_v36, %v3632_v53  ;;  %v4279_v45 = vand.u32 4294901760, %v3362_v48  ;;  %v1176_v36 = vand.u32 4294901760, %v1175_v16  ;;  %v80_v48 = vld [vmem:[%s4197_s5 + $0x1a0] sm:$0xff] }
  0x8c   :  { %1009 = vmatpush.msrb.mxu3 %v3510_v38  ;;  %976 = vmatmul.f32.vlgmr.msrb.gmra.mxu2 %v3495_v39  ;;  %v4240_v15 = vand.u32 4294901760, %v3646_v44  ;;  %v4280_v39 = vand.u32 4294901760, %v3367_v56  ;;  %v3695_v16 = vsub.f32 %v83_v43, %v3665_v23 }
  0x8d   :  { %1030 = vmatpush.msra.mxu0 %v839_v6  ;;  %1126 = vmatpush.msra.mxu2 %v3526_v40  ;;  %v81_v6 = vld [vmem:[%s4197_s5 + $0x1a8] sm:$0xff] }
  0x8e   :  { %914 = vmatpush.msrb.mxu1 %v913_v19  ;;  %1011 = vmatpush.msrb.mxu3 %v3535_v47  ;;  %v3680_v19 = vsub.f32 %v84_v61, %v3648_v46  ;;  %v4241_v61 = vand.u32 4294901760, %v3663_v41  ;;  %v1199_v56 = vsub.f32 %v3646_v44, %v4240_v15 }
  0x8f   :  { %1015 = vmatmul.f32.vlgmr.msrb.gmra.mxu3 %v818_v2  ;;  %1034 = vmatpush.msra.mxu0 %v4279_v45  ;;  %v1182_v2 = vand.u32 4294901760, %v1181_v57  ;;  %v3697_v45 = vand.u32 4294901760, %v81_v6  ;;  %v3710_v57 = vsub.f32 %v82_v62, %v3682_v17 }
  0x90   :  { %1128 = vmatpush.msra.mxu2 %v3551_v12  ;;  %1171 = vmatpush.msra.mxu3 %v1170_v55  ;;  %v1188_v55 = vand.u32 4294901760, %v1187_v49  ;;  %v4242_v43 = vand.u32 4294901760, %v3680_v19  ;;  %v4281_v49 = vand.u32 4294901760, %v3384_v5  ;;  %v78_v5 = vld [vmem:[%s4197_s5 + $0x190] sm:$0xff] }
  0x91   :  { %920 = vmatpush.msrb.mxu1 %v919_v21  ;;  %1038 = vmatpush.msra.mxu0 %v4280_v39  ;;  %v79_v21 = vld [vmem:[%s4197_s5 + $0x198] sm:$0xff]  ;;  %v3712_v39 = vand.u32 4294901760, %v80_v48  ;;  %v3723_v62 = vsub.f32 %v81_v6, %v3697_v45 }
  0x92   :  { %922 = vmatmul.f32.vlgmr.msrb.gmra.mxu1 %v3465_v26  ;;  %1130 = vmatpush.msra.mxu2 %v3571_v1  ;;  %v3725_v15 = vand.u32 4294901760, %v79_v21  ;;  %v1211_v6 = vsub.f32 %v3680_v19, %v4242_v43 }
  0x93   :  { %1089 = vmatpush.msra.mxu1 %v3298_v32  ;;  %1177 = vmatpush.msra.mxu3 %v1176_v36  ;;  %v1205_v32 = vsub.f32 %v3663_v41, %v4241_v61  ;;  %v4243_v36 = vand.u32 4294901760, %v3695_v16  ;;  %v4283_v61 = vand.u32 4294901760, %v3427_v30  ;;  %v76_v30 = vld [vmem:[%s4197_s5 + $0x180] sm:$0xff] }
  0x94   :  { %1042 = vmatpush.msra.mxu0 %v4281_v49  ;;  %1132 = vmatpush.msra.mxu2 %v3579_v28  ;;  %v3739_v49 = vsub.f32 %v80_v48, %v3712_v39  ;;  %v3755_v43 = vsub.f32 %v79_v21, %v3725_v15 }
  0x95   :  { %1091 = vmatpush.msra.mxu1 %v3308_v24  ;;  %1183 = vmatpush.msra.mxu3 %v1182_v2  ;;  %v1200_v24 = vand.u32 4294901760, %v1199_v56  ;;  %v4244_v2 = vand.u32 4294901760, %v3710_v57  ;;  %v1217_v48 = vsub.f32 %v3695_v16, %v4243_v36  ;;  %v4285_v56 = vand.u32 4294901760, %v3458_v0 }
  0x96   :  { %1046 = vmatpush.msra.mxu0 %v4282_v51  ;;  %1134 = vmatpush.msra.mxu2 %v3591_v58  ;;  %v97_v51 = vld.sshfl [vmem:[#allocation1 + $0x18] sm:$0xff pattern:$0x73625140]  ;;  %v1234_v36 = vand.u32 4294901760, %v3739_v49  ;;  %v4287_v0 = vand.u32 4294901760, %v3475_v27 }
  0x97   :  { %1093 = vmatpush.msra.mxu1 %v3318_v18  ;;  %1189 = vmatpush.msra.mxu3 %v1188_v55  ;;  %v3747_v18 = vand.u32 4294901760, %v78_v5  ;;  %v1206_v55 = vand.u32 4294901760, %v1205_v32  ;;  %v1212_v32 = vand.u32 4294901760, %v1211_v6  ;;  %v1223_v21 = vsub.f32 %v3710_v57, %v4244_v2 }
  0x98   :  { %1050 = vmatpush.msra.mxu0 %v4283_v61  ;;  %1136 = vmatpush.msra.mxu2 %v3614_v25  ;;  %v4284_v61 = vand.u32 4294901760, %v3443_v20  ;;  %v1240_v2 = vand.u32 4294901760, %v3755_v43 }
  0x99   :  { %1095 = vmatpush.msra.mxu1 %v3331_v22  ;;  %1195 = vmatpush.msra.mxu3 %v1194_v9  ;;  %v3763_v22 = vand.u32 4294901760, %v77_v34  ;;  %v3765_v9 = vand.u32 4294901760, %v97_v51  ;;  %v3776_v20 = vsub.f32 %v78_v5, %v3747_v18 }
  0x9a   :  { %1054 = vmatpush.msra.mxu0 %v4284_v61  ;;  %1138 = vmatpush.msra.mxu2 %v3632_v53  ;;  %v3778_v61 = vand.u32 4294901760, %v76_v30 }
  0x9b   :  { %1097 = vmatpush.msra.mxu1 %v3341_v37  ;;  %1201 = vmatpush.msra.mxu3 %v1200_v24  ;;  %v1218_v37 = vand.u32 4294901760, %v1217_v48  ;;  %v4286_v24 = vand.u32 4294901760, %v3723_v62  ;;  %v3789_v5 = vsub.f32 %v77_v34, %v3763_v22  ;;  %v4288_v48 = vand.u32 4294901760, %v3487_v31 }
  0x9c   :  { %1058 = vmatpush.msra.mxu0 %v4285_v56  ;;  %1140 = vmatpush.msra.mxu2 %v3648_v46  ;;  %v3792_v56 = vsub.f32 %v97_v51, %v3765_v9  ;;  %v1246_v27 = vand.u32 4294901760, %v3776_v20  ;;  %v3803_v34 = vsub.f32 %v76_v30, %v3778_v61  ;;  %v1241_v51 = vsub.f32 %v3755_v43, %v1240_v2 }
  0x9d   :  { %1099 = vmatpush.msra.mxu1 %v3352_v59  ;;  %1207 = vmatpush.msra.mxu3 %v1206_v55  ;;  %v1229_v6 = vsub.f32 %v3723_v62, %v4286_v24  ;;  %v1224_v59 = vand.u32 4294901760, %v1223_v21  ;;  %v1235_v55 = vsub.f32 %v3739_v49, %v1234_v36  ;;  %v1252_v31 = vand.u32 4294901760, %v3789_v5 }
  0x9e   :  { %1062 = vmatpush.msra.mxu0 %v4287_v0  ;;  %1142 = vmatpush.msra.mxu2 %v3665_v23  ;;  %v1159_v21 = vand.u32 4294901760, %v3792_v56  ;;  %v1242_v24 = vand.u32 4294901760, %v1241_v51 }
  0x9f   :  { %1101 = vmatpush.msra.mxu1 %v3378_v13  ;;  %1213 = vmatpush.msra.mxu3 %v1212_v32  ;;  %v1230_v13 = vand.u32 4294901760, %v1229_v6  ;;  %v4289_v32 = vand.u32 4294901760, %v3503_v29  ;;  %v1236_v30 = vand.u32 4294901760, %v1235_v55  ;;  %v1247_v29 = vsub.f32 %v3776_v20, %v1246_v27 }
  0xa0   :  { %1066 = vmatpush.msra.mxu0 %v4288_v48  ;;  %1144 = vmatpush.msra.mxu2 %v3682_v17  ;;  %v4291_v6 = vand.u32 4294901760, %v3541_v11 }
  0xa1   :  { %1103 = vmatpush.msra.mxu1 %v3394_v14  ;;  %1219 = vmatpush.msra.mxu3 %v1218_v37  ;;  %v4290_v14 = vand.u32 4294901760, %v3521_v7  ;;  %v1258_v37 = vand.u32 4294901760, %v3803_v34  ;;  %v1160_v7 = vsub.f32 %v3792_v56, %v1159_v21  ;;  %v1248_v11 = vand.u32 4294901760, %v1247_v29 }
  0xa2   :  { %1070 = vmatpush.msra.mxu0 %v4289_v32  ;;  %1146 = vmatpush.msra.mxu2 %v3697_v45 }
  0xa3   :  { %1105 = vmatpush.msra.mxu1 %v3408_v52  ;;  %1225 = vmatpush.msra.mxu3 %v1224_v59  ;;  %v1253_v52 = vsub.f32 %v3789_v5, %v1252_v31  ;;  %v1259_v0 = vsub.f32 %v3803_v34, %v1258_v37 }
  0xa4   :  { %1074 = vmatpush.msra.mxu0 %v4290_v14  ;;  %1148 = vmatpush.msra.mxu2 %v3712_v39 }
  0xa5   :  { %1107 = vmatpush.msra.mxu1 %v3424_v10  ;;  %1231 = vmatpush.msra.mxu3 %v1230_v13  ;;  %v4292_v10 = vand.u32 4294901760, %v3569_v3  ;;  %v1254_v59 = vand.u32 4294901760, %v1253_v52  ;;  %v1260_v3 = vand.u32 4294901760, %v1259_v0 }
  0xa6   :  { %1078 = vmatpush.msra.mxu0 %v4291_v6  ;;  %1150 = vmatpush.msra.mxu2 %v3725_v15 }
  0xa7   :  { %1109 = vmatpush.msra.mxu1 %v3439_v35  ;;  %1237 = vmatpush.msra.mxu3 %v1236_v30  ;;  %v1161_v35 = vand.u32 4294901760, %v1160_v7 }
  0xa8   :  { %1082 = vmatpush.msra.mxu0 %v4292_v10  ;;  %1152 = vmatpush.msra.mxu2 %v3747_v18 }
  0xa9   :  { %1111 = vmatpush.msra.mxu1 %v3454_v50  ;;  %1243 = vmatpush.msra.mxu3 %v1242_v24  ;;  %v4293_v50 = vand.u32 4294901760, %v3562_v63 }
  0xaa   :  { %1084 = vmatmul.f32.vlgmr.msra.gmra.mxu0 %v3465_v26  ;;  %1154 = vmatpush.msra.mxu2 %v3763_v22 }
  0xab   :  { %1269 = vmatpush.msrb.mxu0 %v3562_v63  ;;  %1113 = vmatpush.msra.mxu1 %v3471_v8  ;;  %v4294_v8 = vand.u32 4294901760, %v3586_v54 }
  0xac   :  { %1249 = vmatpush.msra.mxu3 %v1248_v11  ;;  %1156 = vmatpush.msra.mxu2 %v3778_v61 }
  0xad   :  { %1272 = vmatpush.msrb.mxu0 %v3586_v54  ;;  %1115 = vmatpush.msra.mxu1 %v3483_v33  ;;  %v4295_v33 = vand.u32 4294901760, %v3599_v60 }
  0xae   :  { %1255 = vmatpush.msra.mxu3 %v1254_v59  ;;  %1162 = vmatmul.f32.vlgmr.msra.gmra.mxu2 %v1161_v35 }
  0xaf   :  { %1275 = vmatpush.msrb.mxu0 %v3599_v60  ;;  %1363 = vmatpush.msrb.mxu2 %v4293_v50 }
  0xb0   :  { %1117 = vmatpush.msra.mxu1 %v3510_v38  ;;  %1261 = vmatpush.msra.mxu3 %v1260_v3  ;;  %v4296_v38 = vand.u32 4294901760, %v3607_v42 }
  0xb1   :  { %1263 = vmatmul.f32.vlgmr.msra.gmra.mxu3 %v3765_v9  ;;  %1278 = vmatpush.msrb.mxu0 %v3607_v42  ;;  %v4299_v42 = vand.u32 4294901760, %v3663_v41 }
  0xb2   :  { %1367 = vmatpush.msrb.mxu2 %v4294_v8  ;;  %1430 = vmatpush.msrb.mxu3 %v3526_v40 }
  0xb3   :  { %1119 = vmatpush.msra.mxu1 %v3535_v47  ;;  %1281 = vmatpush.msrb.mxu0 %v3621_v4  ;;  %v4301_v47 = vand.u32 4294901760, %v3695_v16 }
  0xb4   :  { %1121 = vmatmul.f32.vlgmr.msra.gmra.mxu1 %v3465_v26  ;;  %1371 = vmatpush.msrb.mxu2 %v4295_v33  ;;  %v4297_v26 = vand.u32 4294901760, %v3621_v4 }
  0xb5   :  { %1322 = vmatpush.msrb.mxu1 %v3526_v40  ;;  %1432 = vmatpush.msrb.mxu3 %v3551_v12  ;;  %v4298_v40 = vand.u32 4294901760, %v3646_v44 }
  0xb6   :  { %1284 = vmatpush.msrb.mxu0 %v3646_v44  ;;  %1375 = vmatpush.msrb.mxu2 %v4296_v38 }
  0xb7   :  { %1324 = vmatpush.msrb.mxu1 %v3551_v12  ;;  %1434 = vmatpush.msrb.mxu3 %v3571_v1 }
  0xb8   :  { %1287 = vmatpush.msrb.mxu0 %v3663_v41  ;;  %1379 = vmatpush.msrb.mxu2 %v4297_v26 }
  0xb9   :  { %1326 = vmatpush.msrb.mxu1 %v3571_v1  ;;  %1436 = vmatpush.msrb.mxu3 %v3579_v28  ;;  %v4300_v1 = vand.u32 4294901760, %v3680_v19 }
  0xba   :  { %1290 = vmatpush.msrb.mxu0 %v3680_v19  ;;  %1383 = vmatpush.msrb.mxu2 %v4298_v40 }
  0xbb   :  { %1328 = vmatpush.msrb.mxu1 %v3579_v28  ;;  %1438 = vmatpush.msrb.mxu3 %v3591_v58 }
  0xbc   :  { %1293 = vmatpush.msrb.mxu0 %v3695_v16  ;;  %1387 = vmatpush.msrb.mxu2 %v4299_v42  ;;  %v140_v54 = vpop.f32.mrf.mxu0 }
  0xbd   :  { %1330 = vmatpush.msrb.mxu1 %v3591_v58  ;;  %1440 = vmatpush.msrb.mxu3 %v3614_v25  ;;  %v4302_v58 = vand.u32 4294901760, %v3710_v57 }
  0xbe   :  { %1296 = vmatpush.msrb.mxu0 %v3710_v57  ;;  %1391 = vmatpush.msrb.mxu2 %v4300_v1 }
  0xbf   :  { %1332 = vmatpush.msrb.mxu1 %v3614_v25  ;;  %1442 = vmatpush.msrb.mxu3 %v3632_v53  ;;  %v4303_v25 = vand.u32 4294901760, %v3723_v62 }
  0xc0   :  { %1299 = vmatpush.msrb.mxu0 %v3723_v62  ;;  %1395 = vmatpush.msrb.mxu2 %v4301_v47  ;;  %v1629_v47 = vld [vmem:[%s4195_s3 + $0x18] sm:$0xff] }
  0xc1   :  { %1334 = vmatpush.msrb.mxu1 %v3632_v53  ;;  %1444 = vmatpush.msrb.mxu3 %v3648_v46 }
  0xc2   :  { %1302 = vmatpush.msrb.mxu0 %v3739_v49  ;;  %1399 = vmatpush.msrb.mxu2 %v4302_v58  ;;  %v1648_v58 = vsel %vm1634_vm1, %v1629_v47, 0 }
  0xc3   :  { %1336 = vmatpush.msrb.mxu1 %v3648_v46  ;;  %1446 = vmatpush.msrb.mxu3 %v3665_v23 }
  0xc4   :  { %1305 = vmatpush.msrb.mxu0 %v3755_v43  ;;  %1403 = vmatpush.msrb.mxu2 %v4303_v25  ;;  %v1662_v25 = vand.u32 4294901760, %v1648_v58 }
  0xc5   :  { %1338 = vmatpush.msrb.mxu1 %v3665_v23  ;;  %1448 = vmatpush.msrb.mxu3 %v3682_v17 }
  0xc6   :  { %1308 = vmatpush.msrb.mxu0 %v3776_v20  ;;  %1407 = vmatpush.msrb.mxu2 %v1234_v36  ;;  %v241_v53 = vpop.f32.mrf.mxu1  ;;  %v1467_v36 = vld [vmem:[%s4193_s1] sm:$0x3] }
  0xc7   :  { %1340 = vmatpush.msrb.mxu1 %v3682_v17  ;;  %1450 = vmatpush.msrb.mxu3 %v3697_v45  ;;  %v242_v60 = vadd.f32 %v241_v53, %v140_v54  ;;  %v1692_v53 = vsub.f32 %v1648_v58, %v1662_v25  ;;  %v1628_v54 = vld [vmem:[%s4195_s3 + $0x10] sm:$0xff] }
  0xc8   :  { %1311 = vmatpush.msrb.mxu0 %v3789_v5  ;;  %1411 = vmatpush.msrb.mxu2 %v1240_v2  ;;  %v295_v12 = vpop.f32.mrf.mxu2  ;;  %v334_v4 = vpop.f32.mrf.mxu3  ;;  %v1477_v2 = vsel %vm1472_vm0, %v1467_v36, 0 }
  0xc9   :  { %1342 = vmatpush.msrb.mxu1 %v3697_v45  ;;  %1452 = vmatpush.msrb.mxu3 %v3712_v39  ;;  %v296_v63 = vadd.f32 %v295_v12, %v242_v60  ;;  %v1494_v49 = vand.u32 4294901760, %v1477_v2  ;;  %v1693_v60 = vand.u32 4294901760, %v1692_v53  ;;  %v1645_v12 = vsel %vm1634_vm1, %v1628_v54, 0 }
  0xca   :  { %1314 = vmatpush.msrb.mxu0 %v3803_v34  ;;  %1415 = vmatpush.msrb.mxu2 %v1246_v27 }
  0xcb   :  { %1344 = vmatpush.msrb.mxu1 %v3712_v39  ;;  %1454 = vmatpush.msrb.mxu3 %v3725_v15  ;;  %v335_v28 = vadd.f32 %v334_v4, %v296_v63  ;;  %v1664_v63 = vand.u32 4294901760, %v1645_v12  ;;  %v1694_v4 = vsub.f32 %v1692_v53, %v1693_v60 }
  0xcc   :  { %1317 = vmatmul.f32.vlgmr.msrb.gmra.mxu0 %v3792_v56  ;;  %1419 = vmatpush.msrb.mxu2 %v1252_v31 }
  0xcd   :  { %1346 = vmatpush.msrb.mxu1 %v3725_v15  ;;  %1456 = vmatpush.msrb.mxu3 %v3747_v18  ;;  %v403_v46 = vpop.f32.mrf.mxu0 }
  0xce   :  { %1423 = vmatpush.msrb.mxu2 %v1258_v37  ;;  %v404_v17 = vadd.f32 %v403_v46, %v335_v28  ;;  %1495 = vmatpush.xpose.msra.mxu0 %v1494_v49  ;;  %v1698_v28 = vsub.f32 %v1645_v12, %v1664_v63  ;;  %v1627_v46 = vld [vmem:[%s4195_s3 + $0x8] sm:$0xff] }
  0xcf   :  { %1348 = vmatpush.msrb.mxu1 %v3747_v18  ;;  %1458 = vmatpush.msrb.mxu3 %v3763_v22 }
  0xd0   :  { %1425 = vmatmul.f32.vlgmr.msrb.gmra.mxu2 %v3765_v9  ;;  %v440_v15 = vpop.f32.mrf.mxu1 }
  0xd1   :  { %1350 = vmatpush.msrb.mxu1 %v3763_v22  ;;  %1460 = vmatpush.msrb.mxu3 %v3778_v61  ;;  %v441_v44 = vadd.f32 %v440_v15, %v404_v17  ;;  %v481_v41 = vpop.f32.mrf.mxu2  ;;  %v1521_v22 = vsub.f32 %v1477_v2, %v1494_v49  ;;  %v1695_v17 = vand.u32 4294901760, %v1694_v4  ;;  %v1642_v15 = vsel %vm1634_vm1, %v1627_v46, 0 }
  0xd2   :  { %1462 = vmatmul.f32.vlgmr.msrb.gmra.mxu3 %v3765_v9 }
  0xd3   :  { %1352 = vmatpush.msrb.mxu1 %v3778_v61  ;;  %v482_v23 = vadd.f32 %v481_v41, %v441_v44  ;;  %1571 = vmatpush.xpose.msra.mxu3 %v1494_v49  ;;  %v1522_v20 = vand.u32 4294901760, %v1521_v22  ;;  %v1699_v44 = vand.u32 4294901760, %v1698_v28  ;;  %v1666_v41 = vand.u32 4294901760, %v1642_v15 }
  0xd4   :  { %1356 = vmatmul.f32.vlgmr.msrb.gmra.mxu1 %v1159_v21  ;;  %v582_v19 = vpop.f32.mrf.mxu3  ;;  %1548 = vmatpush.xpose.msra.mxu2 %v1521_v22 }
  0xd5   :  { %v583_v45 = vadd.f32 %v582_v19, %v482_v23  ;;  %v1523_v56 = vsub.f32 %v1521_v22, %v1522_v20  ;;  %1597 = vmatpush.xpose.msrb.mxu0 %v1522_v20  ;;  %v1700_v23 = vsub.f32 %v1698_v28, %v1699_v44  ;;  %v1704_v19 = vsub.f32 %v1642_v15, %v1666_v41 }
  0xd7   :  { %v1524_v27 = vand.u32 4294901760, %v1523_v56  ;;  %1696 = vmatpush.xpose.msrb.mxu3 %v1695_v17 }
  0xd8   :  { %1663 = vmatpush.xpose.msrb.mxu2 %v1662_v25 }
  0xd9   :  { %1525 = vmatpush.xpose.msra.mxu1 %v1524_v27 }
  0xdc   :  { %1665 = vmatpush.xpose.msrb.mxu2 %v1664_v63 }
  0xdd   :  { %1619 = vmatpush.xpose.msrb.mxu1 %v1494_v49 }
  0xe0   :  { %1667 = vmatpush.xpose.msrb.mxu2 %v1666_v41 }
  0xe3   :  { %v636_v16 = vpop.f32.mrf.mxu0 }
  0xe4   :  { %v637_v57 = vadd.f32 %v636_v16, %v583_v45  ;;  %v1626_v16 = vld [vmem:[%s4195_s3] sm:$0xff] }
  0xe5   :  { %v1639_v45 = vsel %vm1634_vm1, %v1626_v16, 0 }
  0xed   :  { %v675_v43 = vpop.f32.mrf.mxu1  ;;  %v744_v62 = vpop.f32.mrf.mxu2 }
  0xee   :  { %v676_v39 = vadd.f32 %v675_v43, %v637_v57  ;;  %v1701_v43 = vand.u32 4294901760, %v1700_v23  ;;  %v1705_v57 = vand.u32 4294901760, %v1704_v19 }
  0xf0   :  { %v745_v18 = vadd.f32 %v744_v62, %v676_v39  ;;  %v781_v9 = vpop.f32.mrf.mxu3  ;;  %v1668_v39 = vand.u32 4294901760, %v1639_v45  ;;  %1702 = vmatpush.xpose.msrb.mxu3 %v1701_v43  ;;  %v1706_v36 = vsub.f32 %v1704_v19, %v1705_v57 }
  0xf2   :  { %v782_v5 = vadd.f32 %v781_v9, %v745_v18  ;;  %v1710_v62 = vsub.f32 %v1639_v45, %v1668_v39  ;;  %1669 = vmatpush.xpose.msrb.mxu2 %v1668_v39  ;;  %v1707_v2 = vand.u32 4294901760, %v1706_v36  ;;  %v2647_v9 = vld [vmem:[%s4194_s2] ss:$0 sm:$0xff]  ;;  %v1867_v45 = vld [vmem:[%s4198_s6 + $0x68] sm:$0xff] }
  0xf4   :  { %v1711_v49 = vand.u32 4294901760, %v1710_v62  ;;  %1708 = vmatpush.xpose.msrb.mxu3 %v1707_v2 }
  0xf6   :  { %v1712_v18 = vsub.f32 %v1710_v62, %v1711_v49 }
  0xf8   :  { %v1713_v22 = vand.u32 4294901760, %v1712_v18 }
  0xfa   :  { %1714 = vmatpush.xpose.msrb.mxu3 %v1713_v22  ;;  %v1859_v22 = vld [vmem:[%s4198_s6 + $0x28] sm:$0xff] }
 0x105   :  { %v822_v61 = vpop.f32.mrf.mxu0 }
 0x106   :  { %v823_v48 = vadd.f32 %v822_v61, %v782_v5 }
 0x10f   :  { %v923_v55 = vpop.f32.mrf.mxu1  ;;  %v977_v13 = vpop.f32.mrf.mxu2 }
 0x110   :  { %v924_v34 = vadd.f32 %v923_v55, %v823_v48 }
 0x112   :  { %v978_v51 = vadd.f32 %v977_v13, %v924_v34  ;;  %v1016_v32 = vpop.f32.mrf.mxu3 }
 0x114   :  { %v1017_v21 = vadd.f32 %v1016_v32, %v978_v51 }
 0x127   :  { %v1085_v31 = vpop.f32.mrf.mxu0 }
 0x128   :  { %v1086_v14 = vadd.f32 %v1085_v31, %v1017_v21 }
 0x131   :  { %v1122_v30 = vpop.f32.mrf.mxu1  ;;  %v1163_v37 = vpop.f32.mrf.mxu2 }
 0x132   :  { %v1123_v29 = vadd.f32 %v1122_v30, %v1086_v14 }
 0x134   :  { %v1164_v24 = vadd.f32 %v1163_v37, %v1123_v29  ;;  %v1264_v6 = vpop.f32.mrf.mxu3 }
 0x136   :  { %v1265_v7 = vadd.f32 %v1264_v6, %v1164_v24 }
 0x149   :  { %v1318_v52 = vpop.f32.mrf.mxu0 }
 0x14a   :  { %v1319_v10 = vadd.f32 %v1318_v52, %v1265_v7  ;;  %v1866_v52 = vld [vmem:[%s4198_s6 + $0x60] sm:$0xff] }
 0x14b   :  { %v1885_v7 = vand.u32 4294901760, %v1866_v52 }
 0x151   :  { %v1357_v11 = vpop.f32.mrf.mxu1 }
 0x152   :  { %v1358_v0 = vadd.f32 %v1357_v11, %v1319_v10  ;;  %v2648_v10 = vld [vmem:[%s4196_s4] ss:$0 sm:$0xff]  ;;  %s2636_s4 = sshll.u32 %s4199_s7, 4  ;;  %s2637_s4 = int_to_ptr.hbm [resolvable:$true] %s2636_s4 }
 0x153   :  { %v1426_v59 = vpop.f32.mrf.mxu2  ;;  %v1862_v11 = vld [vmem:[%s4198_s6 + $0x40] sm:$0xff] }
 0x154   :  { %v1427_v35 = vadd.f32 %v1426_v59, %v1358_v0  ;;  %v1915_v0 = vsub.f32 %v1866_v52, %v1885_v7  ;;  %v3968_v59 = vand.u32 4294901760, %v1862_v11 }
 0x155   :  { %v1463_v3 = vpop.f32.mrf.mxu3 }
 0x156   :  { %v1464_v50 = vadd.f32 %v1463_v3, %v1427_v35  ;;  %v1858_v35 = vld [vmem:[%s4198_s6 + $0x20] sm:$0xff] }
 0x158   :  { %v1466_v8 = vmul.f32 0.0625, %v1464_v50 }
 0x15a   :  { %v1474_v33 = vsel %vm1472_vm0, %v1466_v8, 0  ;;  %v1916_v8 = vand.u32 4294901760, %v1915_v0 }
 0x15b   :  { %v1496_v38 = vand.u32 4294901760, %v1474_v33 }
 0x15d   :  { %v1497_v26 = vsub.f32 %v1474_v33, %v1496_v38  ;;  %1527 = vmatmul.f32.vlgmr.msra.gmra.mxu1 %v1496_v38  ;;  %v1921_v33 = vsub.f32 %v1862_v11, %v3968_v59 }
 0x15e   :  { %1763 = vmatpush.xpose.msra.mxu1 %v1662_v25 }
 0x15f   :  { %1551 = vmatmul.f32.vlgmr.msra.gmra.mxu2 %v1497_v26  ;;  %v1498_v40 = vand.u32 4294901760, %v1497_v26 }
 0x160   :  { %1792 = vmatpush.xpose.msra.mxu2 %v1693_v60 }
 0x161   :  { %1575 = vmatmul.f32.vlgmr.msra.gmra.mxu3 %v1498_v40  ;;  %v1499_v42 = vsub.f32 %v1497_v26, %v1498_v40  ;;  %v1854_v40 = vld [vmem:[%s4198_s6] sm:$0xff] }
 0x162   :  { %1765 = vmatpush.xpose.msra.mxu1 %v1664_v63  ;;  %1823 = vmatpush.xpose.msra.mxu3 %v1662_v25  ;;  %v1891_v58 = vand.u32 4294901760, %v1854_v40 }
 0x163   :  { %v1500_v1 = vand.u32 4294901760, %v1499_v42  ;;  %v1917_v42 = vsub.f32 %v1915_v0, %v1916_v8 }
 0x164   :  { %1796 = vmatpush.xpose.msra.mxu2 %v1699_v44 }
 0x165   :  { %1501 = vmatmul.f32.vlgmr.msra.gmra.mxu0 %v1500_v1  ;;  %1621 = vmatmul.f32.vlgmr.msrb.gmra.mxu1 %v1496_v38  ;;  %v1922_v1 = vand.u32 4294901760, %v1921_v33  ;;  %v1918_v54 = vand.u32 4294901760, %v1917_v42 }
 0x166   :  { %1734 = vmatpush.xpose.msra.mxu0 %v1692_v53  ;;  %1767 = vmatpush.xpose.msra.mxu1 %v1666_v41 }
 0x167   :  { %1825 = vmatpush.xpose.msra.mxu3 %v1664_v63  ;;  %v1923_v60 = vsub.f32 %v1921_v33, %v1922_v1  ;;  %v1933_v63 = vsub.f32 %v1854_v40, %v1891_v58 }
 0x168   :  { %1800 = vmatpush.xpose.msra.mxu2 %v1705_v57 }
 0x169   :  { %v1924_v46 = vand.u32 4294901760, %v1923_v60  ;;  %v1934_v15 = vand.u32 4294901760, %v1933_v63 }
 0x16a   :  { %1737 = vmatpush.xpose.msra.mxu0 %v1698_v28  ;;  %1769 = vmatpush.xpose.msra.mxu1 %v1668_v39 }
 0x16b   :  { %1827 = vmatpush.xpose.msra.mxu3 %v1666_v41 }
 0x16c   :  { %1804 = vmatpush.xpose.msra.mxu2 %v1711_v49 }
 0x16d   :  { %1599 = vmatmul.f32.vlgmr.msrb.gmra.mxu0 %v1496_v38  ;;  %v3975_v38 = vand.u32 4294901760, %v1858_v35 }
 0x16e   :  { %1740 = vmatpush.xpose.msra.mxu0 %v1704_v19  ;;  %1919 = vmatpush.msrb.mxu1 %v1918_v54  ;;  %v1935_v19 = vsub.f32 %v1933_v63, %v1934_v15 }
 0x16f   :  { %1829 = vmatpush.xpose.msra.mxu3 %v1668_v39  ;;  %v1927_v47 = vsub.f32 %v1858_v35, %v3975_v38  ;;  %v3987_v39 = vand.u32 4294901760, %v1867_v45 }
 0x170   :  { %1925 = vmatpush.msrb.mxu1 %v1924_v46  ;;  %v1936_v57 = vand.u32 4294901760, %v1935_v19 }
 0x171   :  { %v1928_v12 = vand.u32 4294901760, %v1927_v47  ;;  %v3993_v2 = vsub.f32 %v1867_v45, %v3987_v39 }
 0x172   :  { %1743 = vmatpush.xpose.msra.mxu0 %v1710_v62  ;;  %v1863_v62 = vld [vmem:[%s4198_s6 + $0x48] sm:$0xff] }
 0x173   :  { %v1929_v17 = vsub.f32 %v1927_v47, %v1928_v12  ;;  %v3996_v49 = vand.u32 4294901760, %v1863_v62  ;;  %v2101_v52 = vand.u32 4294901760, %v3993_v2 }
 0x175   :  { %v1930_v23 = vand.u32 4294901760, %v1929_v17 }
 0x176   :  { %1886 = vmatpush.msrb.mxu0 %v1885_v7 }
 0x177   :  { %1931 = vmatpush.msrb.mxu1 %v1930_v23 }
 0x178   :  { %1888 = vmatpush.msrb.mxu0 %v3968_v59 }
 0x179   :  { %1937 = vmatpush.msrb.mxu1 %v1936_v57 }
 0x17a   :  { %1890 = vmatpush.msrb.mxu0 %v3975_v38 }
 0x17c   :  { %1892 = vmatpush.msrb.mxu0 %v1891_v58 }
 0x1da   :  { %v1528_v20 = vpop.f32.mrf.mxu1 }
 0x1e2   :  { %v1502_v61 = vpop.f32.mrf.mxu0  ;;  %v1552_v55 = vpop.f32.mrf.mxu2 }
 0x1e3   :  { %v1503_v5 = vadd.f32 %v2647_v9, %v1502_v61  ;;  %v1622_v32 = vpop.f32.mrf.mxu1  ;;  %v1855_v9 = vld [vmem:[%s4198_s6 + $0x8] sm:$0xff]  ;;  %v4009_v61 = vand.u32 4294901760, %v1859_v22 }
 0x1e4   :  { %v1576_v27 = vpop.f32.mrf.mxu3 }
 0x1e5   :  { %v1529_v56 = vadd.f32 %v1528_v20, %v1503_v5  ;;  %v4006_v20 = vsub.f32 %v1863_v62, %v3996_v49  ;;  %v4011_v5 = vand.u32 4294901760, %v1855_v9 }
 0x1e7   :  { %v1553_v48 = vadd.f32 %v1552_v55, %v1529_v56  ;;  %v4016_v56 = vsub.f32 %v1859_v22, %v4009_v61  ;;  %v4020_v55 = vsub.f32 %v1855_v9, %v4011_v5  ;;  %v1869_v22 = vld [vmem:[%s4198_s6 + $0x78] sm:$0xff] }
 0x1e8   :  { %v4120_v9 = vand.u32 4294901760, %v1869_v22 }
 0x1e9   :  { %v1577_v34 = vadd.f32 %v1576_v27, %v1553_v48 }
 0x1ea   :  { %v1600_v13 = vpop.f32.mrf.mxu0 }
 0x1eb   :  { %v1601_v51 = vadd.f32 %v1600_v13, %v1577_v34  ;;  %v1868_v34 = vld [vmem:[%s4198_s6 + $0x70] sm:$0xff] }
 0x1ec   :  { %v1864_v13 = vld [vmem:[%s4198_s6 + $0x50] sm:$0xff] }
 0x1ed   :  { %v1623_v31 = vadd.f32 %v1622_v32, %v1601_v51  ;;  %v4032_v51 = vand.u32 4294901760, %v1868_v34  ;;  %v1860_v32 = vld [vmem:[%s4198_s6 + $0x30] sm:$0xff] }
 0x1ef   :  { %v1625_v21 = vmax.f32 %v1623_v31, 0.0  ;;  %v4037_v31 = vand.u32 4294901760, %v1864_v13 }
 0x1f1   :  { %v1636_v30 = vsel %vm1634_vm1, %v1625_v21, 0 }
 0x1f2   :  { %v1670_v14 = vand.u32 4294901760, %v1636_v30 }
 0x1f4   :  { %v1671_v29 = vsub.f32 %v1636_v30, %v1670_v14  ;;  %1716 = vmatmul.f32.vlgmr.msrb.gmra.mxu3 %v1670_v14  ;;  %v4040_v30 = vsub.f32 %v1868_v34, %v4032_v51 }
 0x1f5   :  { %2046 = vmatpush.msrb.mxu3 %v1885_v7 }
 0x1f6   :  { %1746 = vmatmul.f32.vlgmr.msra.gmra.mxu0 %v1671_v29  ;;  %v1672_v37 = vand.u32 4294901760, %v1671_v29 }
 0x1f7   :  { %2048 = vmatpush.msrb.mxu3 %v3968_v59  ;;  %1957 = vmatpush.msra.mxu0 %v1915_v0 }
 0x1f8   :  { %1773 = vmatmul.f32.vlgmr.msra.gmra.mxu1 %v1672_v37  ;;  %v1673_v24 = vsub.f32 %v1671_v29, %v1672_v37  ;;  %v1856_v37 = vld [vmem:[%s4198_s6 + $0x10] sm:$0xff] }
 0x1f9   :  { %2050 = vmatpush.msrb.mxu3 %v3975_v38  ;;  %1960 = vmatpush.msra.mxu0 %v1921_v33  ;;  %v4055_v0 = vand.u32 4294901760, %v1856_v37  ;;  %v2102_v33 = vsub.f32 %v3993_v2, %v2101_v52 }
 0x1fa   :  { %v1674_v6 = vand.u32 4294901760, %v1673_v24  ;;  %1986 = vmatpush.msra.mxu1 %v1885_v7  ;;  %v4048_v24 = vsub.f32 %v1864_v13, %v4037_v31 }
 0x1fb   :  { %2052 = vmatpush.msrb.mxu3 %v1891_v58  ;;  %1963 = vmatpush.msra.mxu0 %v1927_v47 }
 0x1fc   :  { %1675 = vmatmul.f32.vlgmr.msrb.gmra.mxu2 %v1674_v6  ;;  %1831 = vmatmul.f32.vlgmr.msra.gmra.mxu3 %v1670_v14 }
 0x1fd   :  { %2015 = vmatpush.msrb.mxu2 %v1916_v8  ;;  %2171 = vmatpush.msra.mxu3 %v3987_v39 }
 0x1fe   :  { %1966 = vmatpush.msra.mxu0 %v1933_v63  ;;  %1988 = vmatpush.msra.mxu1 %v3968_v59 }
 0x1ff   :  { %2019 = vmatpush.msrb.mxu2 %v1922_v1  ;;  %2173 = vmatpush.msra.mxu3 %v3996_v49  ;;  %v4068_v1 = vsub.f32 %v1856_v37, %v4055_v0 }
 0x200   :  { %1990 = vmatpush.msra.mxu1 %v3975_v38  ;;  %v2113_v38 = vand.u32 4294901760, %v4016_v56 }
 0x201   :  { %2023 = vmatpush.msrb.mxu2 %v1928_v12  ;;  %2175 = vmatpush.msra.mxu3 %v4009_v61  ;;  %v2103_v12 = vand.u32 4294901760, %v2102_v33  ;;  %v2304_v17 = vand.u32 4294901760, %v4068_v1 }
 0x202   :  { %1992 = vmatpush.msra.mxu1 %v1891_v58  ;;  %v2114_v63 = vsub.f32 %v4016_v56, %v2113_v38 }
 0x203   :  { %2027 = vmatpush.msrb.mxu2 %v1934_v15  ;;  %2177 = vmatpush.msra.mxu3 %v4011_v5 }
 0x204   :  { %1806 = vmatmul.f32.vlgmr.msra.gmra.mxu2 %v1670_v14  ;;  %v4042_v14 = vand.u32 4294901760, %v1860_v32  ;;  %v2115_v19 = vand.u32 4294901760, %v2114_v63 }
 0x205   :  { %2142 = vmatpush.msra.mxu2 %v3993_v2 }
 0x206   :  { %v4053_v11 = vsub.f32 %v1860_v32, %v4042_v14 }
 0x207   :  { %2145 = vmatpush.msra.mxu2 %v4006_v20 }
 0x208   :  { %v2298_v42 = vand.u32 4294901760, %v4053_v11 }
 0x209   :  { %2148 = vmatpush.msra.mxu2 %v4016_v56 }
 0x20a   :  { %v2299_v46 = vsub.f32 %v4053_v11, %v2298_v42 }
 0x20b   :  { %2151 = vmatpush.msra.mxu2 %v4020_v55 }
 0x20c   :  { %v2300_v45 = vand.u32 4294901760, %v2299_v46 }
 0x273   :  { %v1747_v53 = vpop.f32.mrf.mxu0 }
 0x275   :  { %v1774_v28 = vpop.f32.mrf.mxu1 }
 0x277   :  { %v1717_v3 = vpop.f32.mrf.mxu3 }
 0x27f   :  { %v1676_v50 = vpop.f32.mrf.mxu2  ;;  %v1832_v43 = vpop.f32.mrf.mxu3 }
 0x280   :  { %v1677_v26 = vadd.f32 %v2648_v10, %v1676_v50  ;;  %v2286_v10 = vand.u32 4294901760, %v4040_v30  ;;  %v2292_v50 = vand.u32 4294901760, %v4048_v24 }
 0x282   :  { %v1718_v25 = vadd.f32 %v1717_v3, %v1677_v26  ;;  %v2107_v3 = vand.u32 4294901760, %v4006_v20  ;;  %v2287_v40 = vsub.f32 %v4040_v30, %v2286_v10  ;;  %v2293_v54 = vsub.f32 %v4048_v24, %v2292_v50 }
 0x284   :  { %v1748_v4 = vadd.f32 %v1747_v53, %v1718_v25  ;;  %v2108_v58 = vsub.f32 %v4006_v20, %v2107_v3  ;;  %v2119_v25 = vand.u32 4294901760, %v4020_v55  ;;  %v2294_v23 = vand.u32 4294901760, %v2293_v54 }
 0x286   :  { %v1775_v44 = vadd.f32 %v1774_v28, %v1748_v4  ;;  %v2288_v28 = vand.u32 4294901760, %v2287_v40  ;;  %v2109_v15 = vand.u32 4294901760, %v2108_v58 }
 0x287   :  { %v1807_v41 = vpop.f32.mrf.mxu2 }
 0x288   :  { %v1808_v16 = vadd.f32 %v1807_v41, %v1775_v44  ;;  %v2120_v44 = vsub.f32 %v4020_v55, %v2119_v25 }
 0x28a   :  { %v1833_v36 = vadd.f32 %v1832_v43, %v1808_v16  ;;  %v2305_v43 = vsub.f32 %v4068_v1, %v2304_v17  ;;  %v2121_v57 = vand.u32 4294901760, %v2120_v44 }
 0x28c   :  { %v2645_v18 = vmul.f32 -1.442695, %v1833_v36 }
 0x28e   :  { %2649 = vpow2.f32 %v2645_v18  ;;  %v2306_v18 = vand.u32 4294901760, %v2305_v43 }
 0x294   :  { %v2650_v48 = vpop.eup %2649 }
 0x295   :  { %v1838_v27 = vadd.f32 1.0, %v2650_v48  ;;  %v1865_v48 = vld [vmem:[%s4198_s6 + $0x58] sm:$0xff] }
 0x297   :  { %2651 = vrcp.f32 %v1838_v27  ;;  %v1850_v7 = vand.u32 2147483648, %v1838_v27  ;;  %v1848_v35 = vand.u32 2147483647, %v1838_v27  ;;  %vm1844_vm3 = vweird.f32 %v1838_v27 }
 0x299   :  { %v1851_v26 = vor.u32 1.1754944e-38, %v1850_v7  ;;  %vm1849_vm5 = vcmp.eq.f32.partialorder %v1848_v35, 8.507059e+37 }
 0x29d   :  { %v2652_v21 = vpop.eup %2651 }
 0x29e   :  { %v1840_v29 = vmul.f32 %v2652_v21, %v1838_v27  ;;  %vm1845_vm2 = vweird.f32 %v2652_v21  ;;  %v4138_v27 = vsub.f32 %v1869_v22, %v4120_v9 }
 0x29f   :  { %vm1846_vm4 = vmor %vm1844_vm3, %vm1845_vm2 }
 0x2a0   :  { %v1841_v6 = vsub.f32 1.0, %v1840_v29  ;;  %v2471_v13 = vand.u32 4294901760, %v4138_v27 }
 0x2a2   :  { %v1842_v59 = vmul.f32 %v2652_v21, %v1841_v6 }
 0x2a4   :  { %v1843_v8 = vadd.f32 %v2652_v21, %v1842_v59 }
 0x2a6   :  { %v1847_v47 = vsel %vm1846_vm4, %v2652_v21, %v1843_v8 }
 0x2a7   :  { %v1852_v53 = vsel %vm1849_vm5, %v1851_v26, %v1847_v47 }
 0x2a8   :  { %v1871_v60 = vsel %vm1472_vm0, %v1852_v53, 0 }
 0x2a9   :  { %v4079_v4 = vand.u32 4294901760, %v1871_v60 }
 0x2ab   :  { %v4089_v41 = vsub.f32 %v1871_v60, %v4079_v4  ;;  %1939 = vmatmul.f32.vlgmr.msrb.gmra.mxu1 %v4079_v4  ;;  %2029 = vmatmul.f32.vlgmr.msrb.gmra.mxu2 %v4079_v4 }
 0x2ac   :  { %2054 = vmatmul.f32.vlgmr.msrb.gmra.mxu3 %v4079_v4  ;;  %2104 = vmatpush.msrb.mxu1 %v2103_v12 }
 0x2ad   :  { %v4095_v16 = vand.u32 4294901760, %v4089_v41  ;;  %2256 = vmatpush.msrb.mxu2 %v4032_v51  ;;  %2289 = vmatpush.msrb.mxu3 %v2288_v28 }
 0x2ae   :  { %2110 = vmatpush.msrb.mxu1 %v2109_v15 }
 0x2af   :  { %v1896_v36 = vsub.f32 %v4089_v41, %v4095_v16  ;;  %2258 = vmatpush.msrb.mxu2 %v4037_v31  ;;  %2295 = vmatpush.msrb.mxu3 %v2294_v23 }
 0x2b0   :  { %2116 = vmatpush.msrb.mxu1 %v2115_v19 }
 0x2b1   :  { %v4102_v62 = vand.u32 4294901760, %v1896_v36  ;;  %2260 = vmatpush.msrb.mxu2 %v4042_v14  ;;  %2301 = vmatpush.msrb.mxu3 %v2300_v45 }
 0x2b2   :  { %2122 = vmatpush.msrb.mxu1 %v2121_v57 }
 0x2b3   :  { %1898 = vmatmul.f32.vlgmr.msrb.gmra.mxu0 %v4102_v62  ;;  %1996 = vmatmul.f32.vlgmr.msra.gmra.mxu1 %v4095_v16 }
 0x2b4   :  { %2154 = vmatmul.f32.vlgmr.msra.gmra.mxu2 %v4089_v41  ;;  %2181 = vmatmul.f32.vlgmr.msra.gmra.mxu3 %v4095_v16 }
 0x2b5   :  { %2262 = vmatpush.msrb.mxu2 %v4055_v0  ;;  %2307 = vmatpush.msrb.mxu3 %v2306_v18 }
 0x2b6   :  { %2071 = vmatpush.msrb.mxu0 %v3987_v39  ;;  %2231 = vmatpush.msra.mxu1 %v3987_v39  ;;  %v1861_v39 = vld [vmem:[%s4198_s6 + $0x38] sm:$0xff] }
 0x2b7   :  { %2385 = vmatpush.msra.mxu2 %v2286_v10  ;;  %2416 = vmatpush.msra.mxu3 %v4032_v51  ;;  %v2444_v34 = vand.u32 4294901760, %v1861_v39 }
 0x2b8   :  { %2073 = vmatpush.msrb.mxu0 %v3996_v49  ;;  %2233 = vmatpush.msra.mxu1 %v3996_v49  ;;  %v4133_v49 = vand.u32 4294901760, %v1865_v48 }
 0x2b9   :  { %2389 = vmatpush.msra.mxu2 %v2292_v50  ;;  %2418 = vmatpush.msra.mxu3 %v4037_v31  ;;  %v2482_v29 = vsub.f32 %v1861_v39, %v2444_v34 }
 0x2ba   :  { %2075 = vmatpush.msrb.mxu0 %v4009_v61  ;;  %2235 = vmatpush.msra.mxu1 %v4009_v61  ;;  %v1857_v61 = vld [vmem:[%s4198_s6 + $0x18] sm:$0xff]  ;;  %v2476_v32 = vsub.f32 %v1865_v48, %v4133_v49  ;;  %s2679_s6 = smov [#allocation2]  }
 0x2bb   :  { %1969 = vmatmul.f32.vlgmr.msra.gmra.mxu0 %v4089_v41  ;;  %2124 = vmatmul.f32.vlgmr.msrb.gmra.mxu1 %v4079_v4  ;;  %v2446_v21 = vand.u32 4294901760, %v1857_v61  ;;  %v2483_v6 = vand.u32 4294901760, %v2482_v29  ;;  %s2634_s24 = sshll.u32 %s2679_s6, 4  ;;  %s2635_s24 = int_to_ptr.vmem [resolvable:$true] %s2634_s24 }
 0x2bc   :  { %2268 = vmatmul.f32.vlgmr.msrb.gmra.mxu2 %v4102_v62  ;;  %2309 = vmatmul.f32.vlgmr.msrb.gmra.mxu3 %v4079_v4  ;;  %v2477_v37 = vand.u32 4294901760, %v2476_v32 }
 0x2bd   :  { %2393 = vmatpush.msra.mxu2 %v2298_v42  ;;  %2420 = vmatpush.msra.mxu3 %v4042_v14  ;;  %v2488_v2 = vsub.f32 %v1857_v61, %v2446_v21 }
 0x2be   :  { %2077 = vmatpush.msrb.mxu0 %v4011_v5  ;;  %2237 = vmatpush.msra.mxu1 %v4011_v5  ;;  %v2472_v5 = vsub.f32 %v4138_v27, %v2471_v13 }
 0x2bf   :  { %2397 = vmatpush.msra.mxu2 %v2304_v17  ;;  %2422 = vmatpush.msra.mxu3 %v4055_v0  ;;  %v2489_v20 = vand.u32 4294901760, %v2488_v2 }
 0x2c0   :  { %2200 = vmatpush.msra.mxu0 %v2101_v52  ;;  %2356 = vmatpush.msrb.mxu1 %v4032_v51  ;;  %v2478_v51 = vsub.f32 %v2476_v32, %v2477_v37  ;;  %v2484_v52 = vsub.f32 %v2482_v29, %v2483_v6 }
 0x2c1   :  { %2512 = vmatpush.msrb.mxu2 %v4138_v27  ;;  %2541 = vmatpush.msrb.mxu3 %v4120_v9  ;;  %v2490_v10 = vsub.f32 %v2488_v2, %v2489_v20 }
 0x2c2   :  { %2204 = vmatpush.msra.mxu0 %v2107_v3  ;;  %2358 = vmatpush.msrb.mxu1 %v4037_v31  ;;  %v2473_v31 = vand.u32 4294901760, %v2472_v5  ;;  %v2479_v7 = vand.u32 4294901760, %v2478_v51  ;;  %v2485_v56 = vand.u32 4294901760, %v2484_v52 }
 0x2c3   :  { %2083 = vmatmul.f32.vlgmr.msrb.gmra.mxu0 %v4102_v62  ;;  %2239 = vmatmul.f32.vlgmr.msra.gmra.mxu1 %v4079_v4  ;;  %v2491_v55 = vand.u32 4294901760, %v2490_v10 }
 0x2c4   :  { %2399 = vmatmul.f32.vlgmr.msra.gmra.mxu2 %v4079_v4  ;;  %2424 = vmatmul.f32.vlgmr.msra.gmra.mxu3 %v4079_v4 }
 0x2c5   :  { %2515 = vmatpush.msrb.mxu2 %v2476_v32  ;;  %2543 = vmatpush.msrb.mxu3 %v4133_v49 }
 0x2c6   :  { %2208 = vmatpush.msra.mxu0 %v2113_v38  ;;  %2360 = vmatpush.msrb.mxu1 %v4042_v14 }
 0x2c7   :  { %2518 = vmatpush.msrb.mxu2 %v2482_v29  ;;  %2545 = vmatpush.msrb.mxu3 %v2444_v34 }
 0x2c8   :  { %2212 = vmatpush.msra.mxu0 %v2119_v25  ;;  %2362 = vmatpush.msrb.mxu1 %v4055_v0 }
 0x2c9   :  { %2521 = vmatpush.msrb.mxu2 %v2488_v2  ;;  %2547 = vmatpush.msrb.mxu3 %v2446_v21 }
 0x2ca   :  { %2327 = vmatpush.msrb.mxu0 %v4040_v30  ;;  %2474 = vmatpush.msra.mxu1 %v2473_v31 }
 0x2cb   :  { %2214 = vmatmul.f32.vlgmr.msra.gmra.mxu0 %v4079_v4  ;;  %2366 = vmatmul.f32.vlgmr.msrb.gmra.mxu1 %v4095_v16 }
 0x2cc   :  { %2524 = vmatmul.f32.vlgmr.msrb.gmra.mxu2 %v4089_v41  ;;  %2551 = vmatmul.f32.vlgmr.msrb.gmra.mxu3 %v4095_v16 }
 0x2cd   :  { %2330 = vmatpush.msrb.mxu0 %v4048_v24  ;;  %2480 = vmatpush.msra.mxu1 %v2479_v7 }
 0x2cf   :  { %2333 = vmatpush.msrb.mxu0 %v4053_v11  ;;  %2486 = vmatpush.msra.mxu1 %v2485_v56 }
 0x2d1   :  { %2336 = vmatpush.msrb.mxu0 %v4068_v1  ;;  %2492 = vmatpush.msra.mxu1 %v2491_v55 }
 0x2d3   :  { %2441 = vmatpush.msra.mxu0 %v4120_v9  ;;  %2601 = vmatpush.msrb.mxu1 %v4120_v9 }
 0x2d4   :  { %2339 = vmatmul.f32.vlgmr.msrb.gmra.mxu0 %v4089_v41  ;;  %2494 = vmatmul.f32.vlgmr.msra.gmra.mxu1 %v4079_v4 }
 0x2d5   :  { %2443 = vmatpush.msra.mxu0 %v4133_v49  ;;  %2603 = vmatpush.msrb.mxu1 %v4133_v49 }
 0x2d7   :  { %2445 = vmatpush.msra.mxu0 %v2444_v34  ;;  %2605 = vmatpush.msrb.mxu1 %v2444_v34 }
 0x2d9   :  { %2447 = vmatpush.msra.mxu0 %v2446_v21  ;;  %2607 = vmatpush.msrb.mxu1 %v2446_v21  ;;  %v4304_v21 = vld [vmem:[#allocation5_spill] sm:$0xff] }
 0x2db   :  { %2570 = vmatpush.msrb.mxu0 %v2471_v13 }
 0x2dc   :  { %2453 = vmatmul.f32.vlgmr.msra.gmra.mxu0 %v4102_v62  ;;  %2609 = vmatmul.f32.vlgmr.msrb.gmra.mxu1 %v4079_v4 }
 0x2dd   :  { %2574 = vmatpush.msrb.mxu0 %v2477_v37 }
 0x2df   :  { %2578 = vmatpush.msrb.mxu0 %v2483_v6 }
 0x2e1   :  { %2582 = vmatpush.msrb.mxu0 %v2489_v20 }
 0x2e4   :  { %2584 = vmatmul.f32.vlgmr.msrb.gmra.mxu0 %v4079_v4 }
 0x328   :  { %v1940_v30 = vpop.f32.mrf.mxu1 }
 0x32e   :  { %v2030_v11 = vpop.f32.mrf.mxu2 }
 0x32f   :  { %v2055_v0 = vpop.f32.mrf.mxu3 }
 0x330   :  { %v1899_v14 = vpop.f32.mrf.mxu0  ;;  %v1997_v24 = vpop.f32.mrf.mxu1 }
 0x331   :  { %v1941_v12 = vadd.f32 %v1940_v30, %v1899_v14 }
 0x337   :  { %v2155_v3 = vpop.f32.mrf.mxu2  ;;  %v2182_v50 = vpop.f32.mrf.mxu3 }
 0x338   :  { %v1970_v59 = vpop.f32.mrf.mxu0  ;;  %v2125_v35 = vpop.f32.mrf.mxu1 }
 0x339   :  { %v1971_v28 = vadd.f32 %v1970_v59, %v1941_v12 }
 0x33b   :  { %v1998_v19 = vadd.f32 %v1997_v24, %v1971_v28 }
 0x33d   :  { %v2031_v62 = vadd.f32 %v2030_v11, %v1998_v19 }
 0x33f   :  { %v2269_v38 = vpop.f32.mrf.mxu2  ;;  %v2310_v40 = vpop.f32.mrf.mxu3  ;;  %v2056_v49 = vadd.f32 %v2055_v0, %v2031_v62 }
 0x340   :  { %v2084_v8 = vpop.f32.mrf.mxu0  ;;  %v2240_v33 = vpop.f32.mrf.mxu1  ;;  %v2311_v25 = vadd.f32 %v2310_v40, %v2269_v38 }
 0x341   :  { %v2126_v58 = vadd.f32 %v2125_v35, %v2084_v8 }
 0x343   :  { %v2156_v54 = vadd.f32 %v2155_v3, %v2126_v58 }
 0x345   :  { %v2183_v46 = vadd.f32 %v2182_v50, %v2156_v54 }
 0x347   :  { %v2400_v1 = vpop.f32.mrf.mxu2  ;;  %v2425_v53 = vpop.f32.mrf.mxu3 }
 0x348   :  { %v2215_v26 = vpop.f32.mrf.mxu0  ;;  %v2367_v42 = vpop.f32.mrf.mxu1 }
 0x349   :  { %v2216_v41 = vadd.f32 %v2215_v26, %v2183_v46 }
 0x34b   :  { %v2241_v43 = vadd.f32 %v2240_v33, %v2216_v41 }
 0x34d   :  { %v2617_v48 = vrot.slane %v2241_v43, 6 }
 0x34f   :  { %v2525_v44 = vpop.f32.mrf.mxu2  ;;  %v2552_v45 = vpop.f32.mrf.mxu3  ;;  %v2621_v34 = vsel %vm2620_vm6, %v2056_v49, %v2617_v48 }
 0x351   :  { %v2340_v47 = vpop.f32.mrf.mxu0  ;;  %v2495_v63 = vpop.f32.mrf.mxu1 }
 0x352   :  { %v2341_v60 = vadd.f32 %v2340_v47, %v2311_v25 }
 0x354   :  { %v2368_v17 = vadd.f32 %v2367_v42, %v2341_v60 }
 0x356   :  { %v2401_v16 = vadd.f32 %v2400_v1, %v2368_v17 }
 0x358   :  { %v2426_v18 = vadd.f32 %v2425_v53, %v2401_v16 }
 0x359   :  { %v2454_v4 = vpop.f32.mrf.mxu0  ;;  %v2610_v9 = vpop.f32.mrf.mxu1 }
 0x35a   :  { %v2496_v15 = vadd.f32 %v2495_v63, %v2454_v4  ;;  %v2618_v27 = vrot.slane %v2426_v18, 4 }
 0x35c   :  { %v2526_v23 = vadd.f32 %v2525_v44, %v2496_v15 }
 0x35e   :  { %v2553_v57 = vadd.f32 %v2552_v45, %v2526_v23 }
 0x361   :  { %v2585_v36 = vpop.f32.mrf.mxu0 }
 0x362   :  { %v2586_v22 = vadd.f32 %v2585_v36, %v2553_v57 }
 0x364   :  { %v2611_v39 = vadd.f32 %v2610_v9, %v2586_v22 }
 0x366   :  { %v2619_v61 = vrot.slane %v2611_v39, 2 }
 0x368   :  { %v2623_v13 = vsel %vm2622_vm7, %v2618_v27, %v2619_v61 }
 0x369   :  { %v2625_v32 = vsel %vm2624_vm8, %v2621_v34, %v2623_v13 }
 0x36a   :  { %v2627_v29 = vmul.f32 %v2625_v32, %v4304_v21 }
 0x36c   :  { %2628 = vst [vmem:[#allocation2] sm:$0xff] %v2627_v29 }
 0x36d   :  { %2639 = dma.vmem_to_hbm [thread:$0]  %s2635_s24, 128, %s2637_s4, [#allocation3]  }
 0x36e   :  { %2677 = dma.done.wait [#allocation3], 128  }
 0x36f   :  { %2678 = vsyncadd [#allocation3], 4294967168 }
 0x370   :  { %2644 = vsyncpa [#allocation3], 1 }

</bundles_post_ra>
